<compile_context>
chip_gen: v5e
topology: v5e:2x2
jax: 0.10.0
libtpu: 0.0.40
codegen_flags: <defaults>
</compile_context>

<pallas_src>
import functools

import jax
import jax.numpy as jnp
from jax.experimental import pallas as pl
from jax.experimental.pallas import tpu as pltpu

LEAKY_SLOPE = 0.2
BN_EPS = 1e-5
COMPUTE_DTYPE = jnp.bfloat16
VMEM_LIMIT = 32 * 1024 * 1024          # raises v5e's 16MiB default, <= v7x physical
TK_MAX = 2048                          # max K-tile (bf16): keeps weight tiles ~2MB
GEMM_VMEM_BUDGET = 12 * 1024 * 1024    # double-buffered working-set budget


def _round_up(x, m):
    return (x + m - 1) // m * m


# ----------------------------------------------------------------------------
# Pallas kernel 1: K-tiled GEMM + shift + optional LeakyReLU
#   out = act(A @ W + shift)
# ----------------------------------------------------------------------------
def _gemm_kernel(a_ref, w_ref, shift_ref, o_ref, acc_ref, *, apply_act):
    k = pl.program_id(1)

    @pl.when(k == 0)
    def _():
        acc_ref[...] = jnp.zeros_like(acc_ref)

    acc_ref[...] += jnp.dot(a_ref[...], w_ref[...],
                            preferred_element_type=jnp.float32)

    @pl.when(k == pl.num_programs(1) - 1)
    def _():
        out = acc_ref[...] + shift_ref[...]
        if apply_act:
            out = jnp.where(out >= 0, out, out * LEAKY_SLOPE)
        o_ref[...] = out.astype(o_ref.dtype)


def _pick_gemm_tiles(M, K, N):
    # K tiling: split K into roughly equal 128-aligned chunks of at most TK_MAX.
    if K <= TK_MAX:
        tk = K                                 # full-K block (ok even if K<128)
    else:
        nk = pl.cdiv(K, TK_MAX)
        tk = _round_up(pl.cdiv(K, nk), 128)
    k_pad = _round_up(K, tk)
    # M tiling: biggest 256-multiple tile whose double-buffered working set
    # fits the budget (A + W bf16 x2, out (worst f32) x2, f32 accumulator).
    tm = 2048
    while tm > 256:
        need = (2 * tm * tk * 2) + (2 * tk * N * 2) + (2 * tm * N * 4) + (tm * N * 4)
        if need <= GEMM_VMEM_BUDGET:
            break
        tm //= 2
    tm = min(tm, _round_up(M, 256))
    m_pad = _round_up(M, tm)
    return tm, tk, m_pad, k_pad


def gemm_affine_act(a, w, shift, *, apply_act, out_dtype=COMPUTE_DTYPE):
    """a: (M, K), w: (K, N), shift: (1, N) f32; N must be a multiple of 128."""
    M, K = a.shape
    Kw, N = w.shape
    assert K == Kw and N % 128 == 0
    tm, tk, m_pad, k_pad = _pick_gemm_tiles(M, K, N)

    a = a.astype(COMPUTE_DTYPE)
    w = w.astype(COMPUTE_DTYPE)
    if m_pad != M or k_pad != K:
        a = jnp.pad(a, ((0, m_pad - M), (0, k_pad - K)))
    if k_pad != K:
        w = jnp.pad(w, ((0, k_pad - K), (0, 0)))
    shift = shift.astype(jnp.float32)

    grid = (m_pad // tm, k_pad // tk)
    out = pl.pallas_call(
        functools.partial(_gemm_kernel, apply_act=apply_act),
        out_shape=jax.ShapeDtypeStruct((m_pad, N), out_dtype),
        grid=grid,
        in_specs=[
            pl.BlockSpec((tm, tk), lambda i, k: (i, k)),
            pl.BlockSpec((tk, N), lambda i, k: (k, 0)),
            pl.BlockSpec((1, N), lambda i, k: (0, 0)),
        ],
        out_specs=pl.BlockSpec((tm, N), lambda i, k: (i, 0)),
        scratch_shapes=[pltpu.VMEM((tm, N), jnp.float32)],
        compiler_params=pltpu.CompilerParams(
            dimension_semantics=("parallel", "arbitrary"),
            vmem_limit_bytes=VMEM_LIMIT,
        ),
    )(a, w, shift)
    return out[:M]


# ----------------------------------------------------------------------------
# Pallas kernel 2: fused stride-1 3x3 conv (+ shift + LeakyReLU)
#
# The padded NHWC input is flattened to (N*Hp*Wp, Cin).  The output is computed
# on the same "canvas" (N*Hp*Wp rows); for canvas row r, the 9 conv taps live at
# input rows r + dy*Wp + dx.  A halo'd slab of tm + 2*Wp + 2 contiguous rows is
# manually DMA'd (double-buffered) into VMEM each grid step and the kernel does
# 9 shifted MXU dots -- no im2col tensor ever hits HBM.  Garbage canvas rows
# (the 2 extra rows/cols per image) are sliced off afterwards.
# ----------------------------------------------------------------------------
def _conv_s1_kernel(x_hbm, w_ref, shift_ref, o_ref, xbuf, sem, acc_ref,
                    *, wp, cin, halo):
    i = pl.program_id(0)
    nsteps = pl.num_programs(0)
    tm = o_ref.shape[0]
    rows = tm + halo

    def start_fetch(step, slot):
        pltpu.make_async_copy(
            x_hbm.at[pl.ds(step * tm, rows), :], xbuf.at[slot], sem.at[slot]
        ).start()

    @pl.when(i == 0)
    def _():
        start_fetch(0, 0)

    slot = i & 1

    # Wait for this step's slab.
    pltpu.make_async_copy(
        x_hbm.at[pl.ds(0, rows), :], xbuf.at[slot], sem.at[slot]
    ).wait()

    # Prefetch next step's slab into the other buffer.
    @pl.when(i + 1 < nsteps)
    def _():
        start_fetch(i + 1, 1 - slot)

    acc_ref[...] = jnp.zeros_like(acc_ref)
    for dy in range(3):
        for dx in range(3):
            off = dy * wp + dx                               # static Python int
            lhs = xbuf[slot, pl.ds(off, tm), :].astype(jnp.bfloat16)
            wk = w_ref[pl.ds((dy * 3 + dx) * cin, cin), :]
            acc_ref[...] += jnp.dot(lhs, wk, preferred_element_type=jnp.float32)

    out = acc_ref[...] + shift_ref[...]
    out = jnp.where(out >= 0, out, out * LEAKY_SLOPE)
    o_ref[...] = out.astype(o_ref.dtype)


def conv3x3_s1_fused(x_nhwc, w_mat, shift, out_dtype=COMPUTE_DTYPE):
    n, h, w, cin = x_nhwc.shape
    assert cin % 128 == 0
    cout = w_mat.shape[1]
    hp, wp = h + 2, w + 2

    # f32 slab in HBM/VMEM: robust unaligned sublane slicing; cast to bf16
    # inside the kernel right before the MXU dot.
    xp = jnp.pad(x_nhwc.astype(jnp.float32), ((0, 0), (1, 1), (1, 1), (0, 0)))
    m = n * hp * wp
    halo = 2 * wp + 2
    tm = min(512, _round_up(m, 8))
    m_pad = _round_up(m, tm)
    xflat = xp.reshape(m, cin)
    xflat = jnp.pad(xflat, ((0, m_pad + halo - m), (0, 0)))

    grid = (m_pad // tm,)
    out = pl.pallas_call(
        functools.partial(_conv_s1_kernel, wp=wp, cin=cin, halo=halo),
        out_shape=jax.ShapeDtypeStruct((m_pad, cout), out_dtype),
        grid=grid,
        in_specs=[
            pl.BlockSpec(memory_space=pl.ANY),               # padded input, manual DMA
            pl.BlockSpec((9 * cin, cout), lambda i: (0, 0)),  # resident weight
            pl.BlockSpec((1, cout), lambda i: (0, 0)),
        ],
        out_specs=pl.BlockSpec((tm, cout), lambda i: (i, 0)),
        scratch_shapes=[
            pltpu.VMEM((2, tm + halo, cin), jnp.float32),    # double-buffered slab
            pltpu.SemaphoreType.DMA((2,)),
            pltpu.VMEM((tm, cout), jnp.float32),             # accumulator
        ],
        compiler_params=pltpu.CompilerParams(
            # "arbitrary": the double-buffer slot handoff assumes sequential steps.
            dimension_semantics=("arbitrary",),
            vmem_limit_bytes=VMEM_LIMIT,
        ),
    )(xflat, w_mat.astype(COMPUTE_DTYPE), shift.astype(jnp.float32))

    out = out[:m].reshape(n, hp, wp, cout)[:, :h, :w, :]
    return out


# ----------------------------------------------------------------------------
# Plain-JAX glue: im2col for stride-2 (and the 1-channel first) conv layers
# ----------------------------------------------------------------------------
def im2col_3x3(x_nhwc, stride):
    n, h, w, c = x_nhwc.shape
    xp = jnp.pad(x_nhwc, ((0, 0), (1, 1), (1, 1), (0, 0)))
    ho = (h + 2 - 3) // stride + 1
    wo = (w + 2 - 3) // stride + 1
    cols = []
    for dy in range(3):
        for dx in range(3):
            cols.append(
                xp[:, dy:dy + stride * (ho - 1) + 1:stride,
                      dx:dx + stride * (wo - 1) + 1:stride, :]
            )
    patches = jnp.concatenate(cols, axis=-1)                 # (N, Ho, Wo, 9*C)
    return patches.reshape(n * ho * wo, 9 * c), (n, ho, wo)


def conv_block(x_nhwc, w_mat, shift, stride, fused, out_dtype):
    if fused:
        return conv3x3_s1_fused(x_nhwc, w_mat, shift, out_dtype)
    patches, (n, ho, wo) = im2col_3x3(x_nhwc, stride)
    cout = w_mat.shape[1]
    out = gemm_affine_act(patches, w_mat, shift, apply_act=True,
                          out_dtype=out_dtype)
    return out.reshape(n, ho, wo, cout)


# ----------------------------------------------------------------------------
# Parameter construction (deterministic, synthetic; BN folded, scale baked in)
# ----------------------------------------------------------------------------
CONV_CFG = [  # (cin, cout, stride, has_bias)
    (1, 64, 1, True),
    (64, 64, 2, False),
    (64, 128, 1, False),
    (128, 128, 2, False),
    (128, 256, 1, False),
    (256, 256, 2, False),
    (256, 512, 1, False),
    (512, 512, 2, False),
    (512, 512, 1, False),
    (512, 512, 2, False),
]


def conv_weight_matrix(key, cin, cout, cin_p, cout_p, scale):
    """PyTorch conv weight (cout, cin, 3, 3) -> im2col matrix (9*cin_p, cout_p)
    with the BN/bias scale folded into the columns and zero-padded channels."""
    wt = jax.random.normal(key, (cout, cin, 3, 3), jnp.float32) * 0.05
    wt = jnp.transpose(wt, (2, 3, 1, 0))                     # (ky, kx, cin, cout)
    wt = wt * scale                                          # fold per-Cout scale
    wp = jnp.zeros((3, 3, cin_p, cout_p), jnp.float32)
    wp = wp.at[:, :, :cin, :cout].set(wt)
    return wp.reshape(9 * cin_p, cout_p)


def bn_fold(key, c):
    k1, k2, k3, k4 = jax.random.split(key, 4)
    gamma = 1.0 + 0.1 * jax.random.normal(k1, (c,), jnp.float32)
    beta = 0.1 * jax.random.normal(k2, (c,), jnp.float32)
    mean = 0.1 * jax.random.normal(k3, (c,), jnp.float32)
    var = jnp.abs(jax.random.normal(k4, (c,), jnp.float32)) * 0.5 + 0.5
    scale = gamma / jnp.sqrt(var + BN_EPS)
    shift = beta - mean * scale
    return scale, shift


def build_params(key):
    params = {"convs": []}
    keys = jax.random.split(key, len(CONV_CFG) * 2 + 4)
    ki = 0
    for li, (cin, cout, stride, has_bias) in enumerate(CONV_CFG):
        cin_p = cin if li == 0 else _round_up(cin, 128)
        cout_p = _round_up(cout, 128)          # lane-dense channel counts
        if has_bias:
            scale = jnp.ones((cout,), jnp.float32)
            shift = 0.05 * jax.random.normal(keys[ki], (cout,), jnp.float32)
        else:
            scale, shift = bn_fold(keys[ki], cout)
        ki += 1
        wm = conv_weight_matrix(keys[ki], cin, cout, cin_p, cout_p, scale)
        ki += 1
        shift_p = jnp.zeros((1, cout_p), jnp.float32).at[0, :cout].set(shift)
        params["convs"].append((wm, shift_p, stride))
    params["_cls_keys"] = tuple(keys[ki:ki + 4])
    return params


def build_classifier(params, in_features):
    k1, k2, k3, k4 = params["_cls_keys"]
    hidden_p = 128                              # 100 -> lane-dense 128 (zero pad)
    w1 = jax.random.normal(k1, (in_features, 100), jnp.float32) * 0.02
    b1 = 0.05 * jax.random.normal(k2, (100,), jnp.float32)
    w2 = jax.random.normal(k3, (100, 1), jnp.float32) * 0.02
    b2 = 0.05 * jax.random.normal(k4, (1,), jnp.float32)
    w1p = jnp.zeros((in_features, hidden_p), jnp.float32).at[:, :100].set(w1)
    b1p = jnp.zeros((1, hidden_p), jnp.float32).at[0, :100].set(b1)
    w2p = jnp.zeros((hidden_p, 128), jnp.float32).at[:100, :1].set(w2)
    b2p = jnp.zeros((1, 128), jnp.float32).at[0, :1].set(b2)
    return (w1p, b1p, w2p, b2p)


# ----------------------------------------------------------------------------
# Forward pass
# ----------------------------------------------------------------------------
def discriminator_forward(x_nchw, params, cls_params):
    # NCHW -> NHWC (internal layout); final conv keeps 512 true channels so the
    # NHWC->NCHW transpose + flatten matches torch.flatten(out, 1) exactly.
    x = jnp.transpose(x_nchw, (0, 2, 3, 1)).astype(jnp.float32)
    convs = params["convs"]
    for li, (wm, shift, stride) in enumerate(convs):
        fused = (stride == 1) and (x.shape[-1] % 128 == 0)
        next_fused = (li + 1 < len(convs)) and (convs[li + 1][2] == 1)
        # Layers feeding a fused conv hand over f32 activations (f32 VMEM slab).
        out_dtype = jnp.float32 if next_fused else COMPUTE_DTYPE
        x = conv_block(x, wm, shift, stride, fused, out_dtype)

    x = jnp.transpose(x, (0, 3, 1, 2))          # NHWC -> NCHW
    n = x.shape[0]
    flat = x.reshape(n, -1)

    w1, b1, w2, b2 = cls_params
    h = gemm_affine_act(flat, w1, b1, apply_act=True)
    out = gemm_affine_act(h, w2, b2, apply_act=False, out_dtype=jnp.float32)
    return out[:, :1]                           # drop lane padding of last linear


if __name__ == "__main__":
    key = jax.random.PRNGKey(0)
    k_params, k_input = jax.random.split(key)

    params = build_params(k_params)

    # Small test input consistent with the module: 1 input channel, NCHW.
    # 32x32 -> five stride-2 convs -> 1x1 feature map.
    x = jax.random.normal(k_input, (2, 1, 32, 32), jnp.float32)

    # Derive flattened feature dim from the conv stack spatial reduction.
    s = x.shape[-1]
    for (_, _, stride) in params["convs"]:
        s = (s + 2 - 3) // stride + 1
    in_features = 512 * s * s
    cls_params = build_classifier(params, in_features)

    out = discriminator_forward(x, params, cls_params)
    out = jax.block_until_ready(out)

    assert out.shape == (2, 1), out.shape
    assert bool(jnp.all(jnp.isfinite(out)))
    print("KERNEL_OK")
</pallas_src>

<mosaic_0001>
module attributes {stable_mosaic.version = 11 : i64} {
  func.func @_gemm_kernel(%arg0: i32, %arg1: i32, %arg2: memref<2048x9xbf16, #tpu.memory_space<vmem>>, %arg3: memref<9x128xbf16, #tpu.memory_space<vmem>>, %arg4: memref<1x128xf32, #tpu.memory_space<vmem>>, %arg5: memref<2048x128xbf16, #tpu.memory_space<vmem>>, %arg6: memref<2048x128xf32, #tpu.memory_space<vmem>>) attributes {dimension_semantics = [#tpu.dimension_semantics<parallel>, #tpu.dimension_semantics<arbitrary>], iteration_bounds = array<i64: 1, 1>, scalar_prefetch = 0 : i64, scratch_operands = 1 : i64, tpu.core_type = #tpu.core_type<tc>, window_params = [{transform_indices = @transform_0, window_bounds = array<i64: 2048, 9>}, {transform_indices = @transform_1, window_bounds = array<i64: 9, 128>}, {pipeline_mode = #tpu.pipeline_mode<synchronous>, transform_indices = @transform_2, window_bounds = array<i64: 1, 128>}, {transform_indices = @transform_3, window_bounds = array<i64: 2048, 128>}]} {
    %c0_i32 = arith.constant 0 : i32
    %0 = arith.cmpi eq, %arg1, %c0_i32 : i32
    %1 = arith.extui %0 : i1 to i32
    %c0_i32_0 = arith.constant 0 : i32
    %2 = arith.cmpi ne, %1, %c0_i32_0 : i32
    scf.if %2 {
      %cst_10 = arith.constant 0.000000e+00 : f32
      %12 = vector.broadcast %cst_10 : f32 to vector<2048x128xf32>
      %c0_11 = arith.constant 0 : index
      %c0_12 = arith.constant 0 : index
      %13 = vector.load %arg6[%c0_11, %c0_12] : memref<2048x128xf32, #tpu.memory_space<vmem>>, vector<2048x128xf32>
      tpu.vector_store %arg6[%c0_11, %c0_12], %12 {strides = array<i32>} : memref<2048x128xf32, #tpu.memory_space<vmem>>, vector<2048x128xf32>,
    } else {
    }
    %c0 = arith.constant 0 : index
    %c0_1 = arith.constant 0 : index
    %3 = vector.load %arg6[%c0, %c0_1] : memref<2048x128xf32, #tpu.memory_space<vmem>>, vector<2048x128xf32>
    %c0_2 = arith.constant 0 : index
    %c0_3 = arith.constant 0 : index
    %4 = vector.load %arg2[%c0_2, %c0_3] : memref<2048x9xbf16, #tpu.memory_space<vmem>>, vector<2048x9xbf16>
    %c0_4 = arith.constant 0 : index
    %c0_5 = arith.constant 0 : index
    %5 = vector.load %arg3[%c0_4, %c0_5] : memref<9x128xbf16, #tpu.memory_space<vmem>>, vector<9x128xbf16>
    %cst = arith.constant dense<0.000000e+00> : vector<2048x128xf32>
    %6 = tpu.matmul %4, %5, %cst {dimension_numbers = #tpu.dot_dimension_numbers<[1], [0], [0], [1], [0, 0, 1, 1], [], []>} : vector<2048x9xbf16>, vector<9x128xbf16>, vector<2048x128xf32> -> vector<2048x128xf32>
    %7 = arith.addf %3, %6 : vector<2048x128xf32>
    %c0_6 = arith.constant 0 : index
    %c0_7 = arith.constant 0 : index
    %8 = vector.load %arg6[%c0_6, %c0_7] : memref<2048x128xf32, #tpu.memory_space<vmem>>, vector<2048x128xf32>
    tpu.vector_store %arg6[%c0_6, %c0_7], %7 {strides = array<i32>} : memref<2048x128xf32, #tpu.memory_space<vmem>>, vector<2048x128xf32>,
    %c0_i32_8 = arith.constant 0 : i32
    %9 = arith.cmpi eq, %arg1, %c0_i32_8 : i32
    %10 = arith.extui %9 : i1 to i32
    %c0_i32_9 = arith.constant 0 : i32
    %11 = arith.cmpi ne, %10, %c0_i32_9 : i32
    scf.if %11 {
      %c0_10 = arith.constant 0 : index
      %c0_11 = arith.constant 0 : index
      %12 = vector.load %arg6[%c0_10, %c0_11] : memref<2048x128xf32, #tpu.memory_space<vmem>>, vector<2048x128xf32>
      %c0_12 = arith.constant 0 : index
      %c0_13 = arith.constant 0 : index
      %13 = vector.load %arg4[%c0_12, %c0_13] : memref<1x128xf32, #tpu.memory_space<vmem>>, vector<1x128xf32>
      %14 = vector.broadcast %13 : vector<1x128xf32> to vector<2048x128xf32>
      %15 = arith.addf %12, %14 : vector<2048x128xf32>
      %cst_14 = arith.constant 0.000000e+00 : f32
      %16 = vector.broadcast %cst_14 : f32 to vector<2048x128xf32>
      %17 = arith.cmpf oge, %15, %16 : vector<2048x128xf32>
      %cst_15 = arith.constant 2.000000e-01 : f32
      %18 = vector.broadcast %cst_15 : f32 to vector<2048x128xf32>
      %19 = arith.mulf %15, %18 : vector<2048x128xf32>
      %20 = arith.select %17, %15, %19 : vector<2048x128xi1>, vector<2048x128xf32>
      %21 = arith.truncf %20 : vector<2048x128xf32> to vector<2048x128xbf16>
      %c0_16 = arith.constant 0 : index
      %c0_17 = arith.constant 0 : index
      %22 = vector.load %arg5[%c0_16, %c0_17] : memref<2048x128xbf16, #tpu.memory_space<vmem>>, vector<2048x128xbf16>
      tpu.vector_store %arg5[%c0_16, %c0_17], %21 {strides = array<i32>} : memref<2048x128xbf16, #tpu.memory_space<vmem>>, vector<2048x128xbf16>,
    } else {
    }
    return
  }
  func.func @transform_0(%arg0: i32, %arg1: i32) -> (i32, i32) {
    %c0_i32 = arith.constant 0 : i32
    return %arg0, %arg1 : i32, i32
  }
  func.func @transform_1(%arg0: i32, %arg1: i32) -> (i32, i32) {
    %c0_i32 = arith.constant 0 : i32
    %c0_i32_0 = arith.constant 0 : i32
    return %arg1, %c0_i32 : i32, i32
  }
  func.func @transform_2(%arg0: i32, %arg1: i32) -> (i32, i32) {
    %c0_i32 = arith.constant 0 : i32
    %c0_i32_0 = arith.constant 0 : i32
    %c0_i32_1 = arith.constant 0 : i32
    return %c0_i32, %c0_i32_0 : i32, i32
  }
  func.func @transform_3(%arg0: i32, %arg1: i32) -> (i32, i32) {
    %c0_i32 = arith.constant 0 : i32
    %c0_i32_0 = arith.constant 0 : i32
    return %arg0, %c0_i32 : i32, i32
  }
}

</mosaic_0001>

<bundles_post_ra>
// kernel: tpu_custom_call.1
= control target key start
LH: loop header
LB: loop body
LE: loop exit
PB: predicated region body
PF: predicated region fallthrough
CT: control target
= control target key end

     0   :  { %vm1820_vm0 = vcmask 1043456   ;;  %vm1821_vm1 = vcmask 1044480   ;;  %v6382_v3 = vmov 65535   ;;  %s7203_s0 = inlined_call_operand.vmem [shape: bf16[2048,9], index: 0, kind: input, shape index: {}]   ;;  %s7204_s1 = inlined_call_operand.vmem [shape: bf16[9,128], index: 1, kind: input, shape index: {}]   ;;  %s7205_s2 = inlined_call_operand.vmem [shape: f32[1,128], index: 2, kind: input, shape index: {}]   ;;  %s7206_s3 = inlined_call_operand.hbm [shape: bf16[2048,128], index: 3, kind: output, shape index: {}]  }
   0x1   :  { %v5319_v0 = vld [vmem:[%s7204_s1] sm:$0xf]  ;;  %v5577_v1 = vld [vmem:[%s7204_s1] sm:$0x10]  ;;  %v1822_v4 = vsel %vm1820_vm0, 4294967295, %v6382_v3 }
   0x2   :  { %v5320_v2 = vor.u32 %v5577_v1, %v5319_v0  ;;  %v1823_v5 = vsel %vm1821_vm1, %v1822_v4, 0 }
   0x4   :  { %v1825_v6 = vand.u32 %v5320_v2, %v1823_v5 }
   0x5   :  { %8 = vsyncpa [#allocation4], 0  ;;  %v5449_v7 = vld [vmem:[%s7203_s0] sm:$0xff]  ;;  %vm1435_vm2 = vcmask 72704   ;;  %v5450_v11 = vld [vmem:[%s7203_s0 + $0x8] sm:$0xff]  ;;  %s4793_s29 = sshll.u32 %s7206_s3, 4  ;;  %s4794_s29 = int_to_ptr.hbm [resolvable:$true] %s4793_s29 }
   0x6   :  { %v5481_v8 = vld [vmem:[%s7203_s0 + $0x100] sm:$0xff]  ;;  %1834 = vmatpush.bf16.msra.mxu0 %v1825_v6  ;;  %6345 = vmatpush.bf16.msra.mxu1 %v1825_v6  ;;  %v5482_v12 = vld [vmem:[%s7203_s0 + $0x108] sm:$0xff]  ;;  %v5451_v15 = vld [vmem:[%s7203_s0 + $0x10] sm:$0xff]  ;;  %s6384_s30 = smov 64   ;;  %s6385_s4 = smov 4  }
   0x7   :  { %v5513_v9 = vld [vmem:[%s7203_s0 + $0x200] sm:$0xff]  ;;  %6346 = vmatpush.bf16.msra.mxu2 %v1825_v6  ;;  %6347 = vmatpush.bf16.msra.mxu3 %v1825_v6  ;;  %v5514_v13 = vld [vmem:[%s7203_s0 + $0x208] sm:$0xff]  ;;  %v5483_v16 = vld [vmem:[%s7203_s0 + $0x110] sm:$0xff] }
   0x8   :  { %v5545_v10 = vld [vmem:[%s7203_s0 + $0x300] sm:$0xff]  ;;  %v5546_v14 = vld [vmem:[%s7203_s0 + $0x308] sm:$0xff]  ;;  %v5515_v17 = vld [vmem:[%s7203_s0 + $0x210] sm:$0xff] }
   0x9   :  { %5321 = vmatmul.msk.bf16.vlgmr.msra.gmra.mxu0 %vm1435_vm2, %v5449_v7  ;;  %5353 = vmatmul.msk.bf16.vlgmr.msra.gmra.mxu1 %vm1435_vm2, %v5481_v8  ;;  %v5547_v18 = vld [vmem:[%s7203_s0 + $0x310] sm:$0xff]  ;;  %v5452_v19 = vld [vmem:[%s7203_s0 + $0x18] sm:$0xff]  ;;  %v5453_v23 = vld [vmem:[%s7203_s0 + $0x20] sm:$0xff] }
   0xa   :  { %5385 = vmatmul.msk.bf16.vlgmr.msra.gmra.mxu2 %vm1435_vm2, %v5513_v9  ;;  %5417 = vmatmul.msk.bf16.vlgmr.msra.gmra.mxu3 %vm1435_vm2, %v5545_v10  ;;  %v5484_v20 = vld [vmem:[%s7203_s0 + $0x118] sm:$0xff]  ;;  %v5485_v24 = vld [vmem:[%s7203_s0 + $0x120] sm:$0xff]  ;;  %v5454_v27 = vld [vmem:[%s7203_s0 + $0x28] sm:$0xff] }
   0xb   :  { %v5516_v21 = vld [vmem:[%s7203_s0 + $0x218] sm:$0xff]  ;;  %v5517_v25 = vld [vmem:[%s7203_s0 + $0x220] sm:$0xff]  ;;  %v5486_v28 = vld [vmem:[%s7203_s0 + $0x128] sm:$0xff] }
   0xc   :  { %v5548_v22 = vld [vmem:[%s7203_s0 + $0x318] sm:$0xff]  ;;  %v5549_v26 = vld [vmem:[%s7203_s0 + $0x320] sm:$0xff]  ;;  %v5518_v29 = vld [vmem:[%s7203_s0 + $0x228] sm:$0xff] }
   0xd   :  { %v5550_v30 = vld [vmem:[%s7203_s0 + $0x328] sm:$0xff]  ;;  %v5455_v31 = vld [vmem:[%s7203_s0 + $0x30] sm:$0xff]  ;;  %v5456_v35 = vld [vmem:[%s7203_s0 + $0x38] sm:$0xff] }
   0xe   :  { %v5487_v32 = vld [vmem:[%s7203_s0 + $0x130] sm:$0xff]  ;;  %v5488_v36 = vld [vmem:[%s7203_s0 + $0x138] sm:$0xff]  ;;  %v5457_v39 = vld [vmem:[%s7203_s0 + $0x40] sm:$0xff] }
   0xf   :  { %v5519_v33 = vld [vmem:[%s7203_s0 + $0x230] sm:$0xff]  ;;  %v5520_v37 = vld [vmem:[%s7203_s0 + $0x238] sm:$0xff]  ;;  %v5489_v40 = vld [vmem:[%s7203_s0 + $0x140] sm:$0xff] }
  0x10   :  { %v5551_v34 = vld [vmem:[%s7203_s0 + $0x330] sm:$0xff]  ;;  %v5552_v38 = vld [vmem:[%s7203_s0 + $0x338] sm:$0xff]  ;;  %v5521_v43 = vld [vmem:[%s7203_s0 + $0x240] sm:$0xff] }
  0x11   :  { %v5553_v44 = vld [vmem:[%s7203_s0 + $0x340] sm:$0xff]  ;;  %v5458_v5 = vld [vmem:[%s7203_s0 + $0x48] sm:$0xff] }
  0x12   :  { %v6555_v45 = vld [vmem:[%s7205_s2] ss:$0 sm:$0xff]  ;;  %v5490_v6 = vld [vmem:[%s7203_s0 + $0x148] sm:$0xff] }
  0x19   :  { %5322 = vmatmul.msk.bf16.gmra.mxu0 %vm1435_vm2, %v5450_v11  ;;  %5354 = vmatmul.msk.bf16.gmra.mxu1 %vm1435_vm2, %v5482_v12  ;;  %v5522_v12 = vld [vmem:[%s7203_s0 + $0x248] sm:$0xff] }
  0x1a   :  { %5386 = vmatmul.msk.bf16.gmra.mxu2 %vm1435_vm2, %v5514_v13  ;;  %5418 = vmatmul.msk.bf16.gmra.mxu3 %vm1435_vm2, %v5546_v14  ;;  %v5554_v13 = vld [vmem:[%s7203_s0 + $0x348] sm:$0xff] }
  0x29   :  { %5323 = vmatmul.msk.bf16.gmra.mxu0 %vm1435_vm2, %v5451_v15  ;;  %5355 = vmatmul.msk.bf16.gmra.mxu1 %vm1435_vm2, %v5483_v16 }
  0x2a   :  { %5387 = vmatmul.msk.bf16.gmra.mxu2 %vm1435_vm2, %v5515_v17  ;;  %5419 = vmatmul.msk.bf16.gmra.mxu3 %vm1435_vm2, %v5547_v18 }
  0x39   :  { %5324 = vmatmul.msk.bf16.gmra.mxu0 %vm1435_vm2, %v5452_v19  ;;  %5356 = vmatmul.msk.bf16.gmra.mxu1 %vm1435_vm2, %v5484_v20 }
  0x3a   :  { %5388 = vmatmul.msk.bf16.gmra.mxu2 %vm1435_vm2, %v5516_v21  ;;  %5420 = vmatmul.msk.bf16.gmra.mxu3 %vm1435_vm2, %v5548_v22 }
  0x49   :  { %5325 = vmatmul.msk.bf16.gmra.mxu0 %vm1435_vm2, %v5453_v23  ;;  %5357 = vmatmul.msk.bf16.gmra.mxu1 %vm1435_vm2, %v5485_v24 }
  0x4a   :  { %5389 = vmatmul.msk.bf16.gmra.mxu2 %vm1435_vm2, %v5517_v25  ;;  %5421 = vmatmul.msk.bf16.gmra.mxu3 %vm1435_vm2, %v5549_v26 }
  0x59   :  { %5326 = vmatmul.msk.bf16.gmra.mxu0 %vm1435_vm2, %v5454_v27  ;;  %5358 = vmatmul.msk.bf16.gmra.mxu1 %vm1435_vm2, %v5486_v28 }
  0x5a   :  { %5390 = vmatmul.msk.bf16.gmra.mxu2 %vm1435_vm2, %v5518_v29  ;;  %5422 = vmatmul.msk.bf16.gmra.mxu3 %vm1435_vm2, %v5550_v30 }
  0x69   :  { %5327 = vmatmul.msk.bf16.gmra.mxu0 %vm1435_vm2, %v5455_v31  ;;  %5359 = vmatmul.msk.bf16.gmra.mxu1 %vm1435_vm2, %v5487_v32 }
  0x6a   :  { %5391 = vmatmul.msk.bf16.gmra.mxu2 %vm1435_vm2, %v5519_v33  ;;  %5423 = vmatmul.msk.bf16.gmra.mxu3 %vm1435_vm2, %v5551_v34 }
  0x79   :  { %5328 = vmatmul.msk.bf16.gmra.mxu0 %vm1435_vm2, %v5456_v35  ;;  %5360 = vmatmul.msk.bf16.gmra.mxu1 %vm1435_vm2, %v5488_v36 }
  0x7a   :  { %5392 = vmatmul.msk.bf16.gmra.mxu2 %vm1435_vm2, %v5520_v37  ;;  %5424 = vmatmul.msk.bf16.gmra.mxu3 %vm1435_vm2, %v5552_v38 }
  0x86   :  { %v1836_v41 = vpop.f32.mrf.mxu0  ;;  %v1996_v42 = vpop.f32.mrf.mxu1 }
  0x87   :  { %v3251_v46 = vadd.f32 %v6555_v45, %v1836_v41  ;;  %v3315_v47 = vadd.f32 %v6555_v45, %v1996_v42 }
  0x89   :  { %5329 = vmatmul.msk.bf16.gmra.mxu0 %vm1435_vm2, %v5457_v39  ;;  %5361 = vmatmul.msk.bf16.gmra.mxu1 %vm1435_vm2, %v5489_v40  ;;  %v3763_v52 = vmul.f32 0.2, %v3251_v46  ;;  %v3827_v53 = vmul.f32 0.2, %v3315_v47  ;;  %vm3507_vm3 = vcmp.ge.f32.partialorder %v3251_v46, 0.0  ;;  %vm3571_vm4 = vcmp.ge.f32.partialorder %v3315_v47, 0.0 }
  0x8a   :  { %5393 = vmatmul.msk.bf16.gmra.mxu2 %vm1435_vm2, %v5521_v43  ;;  %5425 = vmatmul.msk.bf16.gmra.mxu3 %vm1435_vm2, %v5553_v44 }
  0x8b   :  { %v4019_v60 = vsel %vm3507_vm3, %v3251_v46, %v3763_v52  ;;  %v4083_v61 = vsel %vm3571_vm4, %v3315_v47, %v3827_v53  ;;  %v5459_v46 = vld [vmem:[%s7203_s0 + $0x50] sm:$0xff] }
  0x8c   :  { %v5491_v47 = vld [vmem:[%s7203_s0 + $0x150] sm:$0xff] }
  0x8d   :  { %v2156_v48 = vpop.f32.mrf.mxu2  ;;  %v2316_v49 = vpop.f32.mrf.mxu3  ;;  %v5523_v53 = vld [vmem:[%s7203_s0 + $0x250] sm:$0xff] }
  0x8e   :  { %v1838_v50 = vpop.f32.mrf.mxu0  ;;  %v1998_v51 = vpop.f32.mrf.mxu1  ;;  %v3379_v56 = vadd.f32 %v6555_v45, %v2156_v48  ;;  %v3443_v59 = vadd.f32 %v6555_v45, %v2316_v49 }
  0x8f   :  { %v3252_v54 = vadd.f32 %v6555_v45, %v1838_v50  ;;  %v3316_v55 = vadd.f32 %v6555_v45, %v1998_v51 }
  0x90   :  { %v3891_v2 = vmul.f32 0.2, %v3379_v56  ;;  %vm3635_vm7 = vcmp.ge.f32.partialorder %v3379_v56, 0.0  ;;  %v3955_v7 = vmul.f32 0.2, %v3443_v59  ;;  %vm3699_vm8 = vcmp.ge.f32.partialorder %v3443_v59, 0.0 }
  0x91   :  { %vm3508_vm5 = vcmp.ge.f32.partialorder %v3252_v54, 0.0  ;;  %v3764_v57 = vmul.f32 0.2, %v3252_v54  ;;  %vm3572_vm6 = vcmp.ge.f32.partialorder %v3316_v55, 0.0  ;;  %v3828_v58 = vmul.f32 0.2, %v3316_v55 }
  0x92   :  { %v4147_v16 = vsel %vm3635_vm7, %v3379_v56, %v3891_v2  ;;  %v4211_v17 = vsel %vm3699_vm8, %v3443_v59, %v3955_v7 }
  0x93   :  { %v4020_v62 = vsel %vm3508_vm5, %v3252_v54, %v3764_v57  ;;  %v4084_v63 = vsel %vm3572_vm6, %v3316_v55, %v3828_v58  ;;  %v5555_v54 = vld [vmem:[%s7203_s0 + $0x350] sm:$0xff] }
  0x94   :  { %v5581_v0 = vpack.c.bf16 %v4020_v62, %v4019_v60  ;;  %v5741_v1 = vpack.c.bf16 %v4084_v63, %v4083_v61 }
  0x95   :  { %v2158_v3 = vpop.f32.mrf.mxu2  ;;  %v2318_v4 = vpop.f32.mrf.mxu3 }
  0x96   :  { %5582 = vst [vmem:[#allocation3] sm:$0xff] %v5581_v0   ;;  %v3380_v8 = vadd.f32 %v6555_v45, %v2158_v3  ;;  %v3444_v9 = vadd.f32 %v6555_v45, %v2318_v4  ;;  %v1841_v10 = vpop.f32.mrf.mxu0  ;;  %v2001_v11 = vpop.f32.mrf.mxu1 }
  0x97   :  { %6249 = vst [vmem:[#allocation3 + $0x100] sm:$0xff] %v5741_v1   ;;  %v3253_v22 = vadd.f32 %v6555_v45, %v1841_v10  ;;  %v3317_v23 = vadd.f32 %v6555_v45, %v2001_v11 }
  0x98   :  { %vm3636_vm9 = vcmp.ge.f32.partialorder %v3380_v8, 0.0  ;;  %v3892_v14 = vmul.f32 0.2, %v3380_v8  ;;  %vm3700_vm10 = vcmp.ge.f32.partialorder %v3444_v9, 0.0  ;;  %v3956_v15 = vmul.f32 0.2, %v3444_v9 }
  0x99   :  { %5330 = vmatmul.msk.bf16.gmra.mxu0 %vm1435_vm2, %v5458_v5  ;;  %5362 = vmatmul.msk.bf16.gmra.mxu1 %vm1435_vm2, %v5490_v6  ;;  %v3765_v28 = vmul.f32 0.2, %v3253_v22  ;;  %v3829_v29 = vmul.f32 0.2, %v3317_v23  ;;  %vm3509_vm11 = vcmp.ge.f32.partialorder %v3253_v22, 0.0  ;;  %vm3573_vm12 = vcmp.ge.f32.partialorder %v3317_v23, 0.0 }
  0x9a   :  { %v4148_v18 = vsel %vm3636_vm9, %v3380_v8, %v3892_v14  ;;  %v4212_v19 = vsel %vm3700_vm10, %v3444_v9, %v3956_v15  ;;  %5394 = vmatmul.msk.bf16.gmra.mxu2 %vm1435_vm2, %v5522_v12  ;;  %5426 = vmatmul.msk.bf16.gmra.mxu3 %vm1435_vm2, %v5554_v13 }
  0x9b   :  { %v5901_v20 = vpack.c.bf16 %v4148_v18, %v4147_v16  ;;  %v6061_v21 = vpack.c.bf16 %v4212_v19, %v4211_v17  ;;  %v4021_v36 = vsel %vm3509_vm11, %v3253_v22, %v3765_v28  ;;  %v4085_v37 = vsel %vm3573_vm12, %v3317_v23, %v3829_v29  ;;  %v5460_v22 = vld [vmem:[%s7203_s0 + $0x58] sm:$0xff] }
  0x9c   :  { %v5492_v23 = vld [vmem:[%s7203_s0 + $0x158] sm:$0xff] }
  0x9d   :  { %6281 = vst [vmem:[#allocation3 + $0x200] sm:$0xff] %v5901_v20   ;;  %v2161_v24 = vpop.f32.mrf.mxu2  ;;  %v2321_v25 = vpop.f32.mrf.mxu3  ;;  %v5524_v29 = vld [vmem:[%s7203_s0 + $0x258] sm:$0xff] }
  0x9e   :  { %6313 = vst [vmem:[#allocation3 + $0x300] sm:$0xff] %v6061_v21   ;;  %v1843_v26 = vpop.f32.mrf.mxu0  ;;  %v2003_v27 = vpop.f32.mrf.mxu1  ;;  %v3381_v32 = vadd.f32 %v6555_v45, %v2161_v24  ;;  %v3445_v35 = vadd.f32 %v6555_v45, %v2321_v25 }
  0x9f   :  { %v3254_v30 = vadd.f32 %v6555_v45, %v1843_v26  ;;  %v3318_v31 = vadd.f32 %v6555_v45, %v2003_v27 }
  0xa0   :  { %v3893_v42 = vmul.f32 0.2, %v3381_v32  ;;  %vm3637_vm15 = vcmp.ge.f32.partialorder %v3381_v32, 0.0  ;;  %v3957_v48 = vmul.f32 0.2, %v3445_v35  ;;  %vm3701_vm0 = vcmp.ge.f32.partialorder %v3445_v35, 0.0 }
  0xa1   :  { %vm3510_vm13 = vcmp.ge.f32.partialorder %v3254_v30, 0.0  ;;  %v3766_v33 = vmul.f32 0.2, %v3254_v30  ;;  %vm3574_vm14 = vcmp.ge.f32.partialorder %v3318_v31, 0.0  ;;  %v3830_v34 = vmul.f32 0.2, %v3318_v31 }
  0xa2   :  { %v4149_v57 = vsel %vm3637_vm15, %v3381_v32, %v3893_v42  ;;  %v4213_v58 = vsel %vm3701_vm0, %v3445_v35, %v3957_v48 }
  0xa3   :  { %v4022_v38 = vsel %vm3510_vm13, %v3254_v30, %v3766_v33  ;;  %v4086_v39 = vsel %vm3574_vm14, %v3318_v31, %v3830_v34  ;;  %v5556_v30 = vld [vmem:[%s7203_s0 + $0x358] sm:$0xff] }
  0xa4   :  { %v5586_v40 = vpack.c.bf16 %v4022_v38, %v4021_v36  ;;  %v5746_v41 = vpack.c.bf16 %v4086_v39, %v4085_v37 }
  0xa5   :  { %v2163_v43 = vpop.f32.mrf.mxu2  ;;  %v2323_v44 = vpop.f32.mrf.mxu3 }
  0xa6   :  { %6218 = vst [vmem:[#allocation3 + $0x8] sm:$0xff] %v5586_v40   ;;  %v3382_v49 = vadd.f32 %v6555_v45, %v2163_v43  ;;  %v3446_v50 = vadd.f32 %v6555_v45, %v2323_v44  ;;  %v1846_v51 = vpop.f32.mrf.mxu0  ;;  %v2006_v52 = vpop.f32.mrf.mxu1 }
  0xa7   :  { %6250 = vst [vmem:[#allocation3 + $0x108] sm:$0xff] %v5746_v41   ;;  %v3255_v63 = vadd.f32 %v6555_v45, %v1846_v51  ;;  %v3319_v0 = vadd.f32 %v6555_v45, %v2006_v52 }
  0xa8   :  { %vm3638_vm1 = vcmp.ge.f32.partialorder %v3382_v49, 0.0  ;;  %v3894_v55 = vmul.f32 0.2, %v3382_v49  ;;  %vm3702_vm3 = vcmp.ge.f32.partialorder %v3446_v50, 0.0  ;;  %v3958_v56 = vmul.f32 0.2, %v3446_v50 }
  0xa9   :  { %5331 = vmatmul.msk.bf16.gmra.mxu0 %vm1435_vm2, %v5459_v46  ;;  %5363 = vmatmul.msk.bf16.gmra.mxu1 %vm1435_vm2, %v5491_v47  ;;  %v3767_v5 = vmul.f32 0.2, %v3255_v63  ;;  %v3831_v6 = vmul.f32 0.2, %v3319_v0  ;;  %vm3511_vm4 = vcmp.ge.f32.partialorder %v3255_v63, 0.0  ;;  %vm3575_vm5 = vcmp.ge.f32.partialorder %v3319_v0, 0.0 }
  0xaa   :  { %v4150_v59 = vsel %vm3638_vm1, %v3382_v49, %v3894_v55  ;;  %v4214_v60 = vsel %vm3702_vm3, %v3446_v50, %v3958_v56  ;;  %5395 = vmatmul.msk.bf16.gmra.mxu2 %vm1435_vm2, %v5523_v53  ;;  %5427 = vmatmul.msk.bf16.gmra.mxu3 %vm1435_vm2, %v5555_v54 }
  0xab   :  { %v5906_v61 = vpack.c.bf16 %v4150_v59, %v4149_v57  ;;  %v6066_v62 = vpack.c.bf16 %v4214_v60, %v4213_v58  ;;  %v4023_v13 = vsel %vm3511_vm4, %v3255_v63, %v3767_v5  ;;  %v4087_v14 = vsel %vm3575_vm5, %v3319_v0, %v3831_v6  ;;  %v5461_v63 = vld [vmem:[%s7203_s0 + $0x60] sm:$0xff] }
  0xac   :  { %v5493_v0 = vld [vmem:[%s7203_s0 + $0x160] sm:$0xff] }
  0xad   :  { %6282 = vst [vmem:[#allocation3 + $0x208] sm:$0xff] %v5906_v61   ;;  %v2166_v1 = vpop.f32.mrf.mxu2  ;;  %v2326_v2 = vpop.f32.mrf.mxu3  ;;  %v5525_v6 = vld [vmem:[%s7203_s0 + $0x260] sm:$0xff] }
  0xae   :  { %6314 = vst [vmem:[#allocation3 + $0x308] sm:$0xff] %v6066_v62   ;;  %v1848_v3 = vpop.f32.mrf.mxu0  ;;  %v2008_v4 = vpop.f32.mrf.mxu1  ;;  %v3383_v9 = vadd.f32 %v6555_v45, %v2166_v1  ;;  %v3447_v12 = vadd.f32 %v6555_v45, %v2326_v2 }
  0xaf   :  { %v3256_v7 = vadd.f32 %v6555_v45, %v1848_v3  ;;  %v3320_v8 = vadd.f32 %v6555_v45, %v2008_v4 }
  0xb0   :  { %v3895_v19 = vmul.f32 0.2, %v3383_v9  ;;  %vm3639_vm8 = vcmp.ge.f32.partialorder %v3383_v9, 0.0  ;;  %v3959_v24 = vmul.f32 0.2, %v3447_v12  ;;  %vm3703_vm9 = vcmp.ge.f32.partialorder %v3447_v12, 0.0 }
  0xb1   :  { %vm3512_vm6 = vcmp.ge.f32.partialorder %v3256_v7, 0.0  ;;  %v3768_v10 = vmul.f32 0.2, %v3256_v7  ;;  %vm3576_vm7 = vcmp.ge.f32.partialorder %v3320_v8, 0.0  ;;  %v3832_v11 = vmul.f32 0.2, %v3320_v8 }
  0xb2   :  { %v4151_v33 = vsel %vm3639_vm8, %v3383_v9, %v3895_v19  ;;  %v4215_v34 = vsel %vm3703_vm9, %v3447_v12, %v3959_v24 }
  0xb3   :  { %v4024_v15 = vsel %vm3512_vm6, %v3256_v7, %v3768_v10  ;;  %v4088_v16 = vsel %vm3576_vm7, %v3320_v8, %v3832_v11  ;;  %v5557_v7 = vld [vmem:[%s7203_s0 + $0x360] sm:$0xff] }
  0xb4   :  { %v5591_v17 = vpack.c.bf16 %v4024_v15, %v4023_v13  ;;  %v5751_v18 = vpack.c.bf16 %v4088_v16, %v4087_v14 }
  0xb5   :  { %v2168_v20 = vpop.f32.mrf.mxu2  ;;  %v2328_v21 = vpop.f32.mrf.mxu3 }
  0xb6   :  { %6219 = vst [vmem:[#allocation3 + $0x10] sm:$0xff] %v5591_v17   ;;  %v3384_v25 = vadd.f32 %v6555_v45, %v2168_v20  ;;  %v3448_v26 = vadd.f32 %v6555_v45, %v2328_v21  ;;  %v1851_v27 = vpop.f32.mrf.mxu0  ;;  %v2011_v28 = vpop.f32.mrf.mxu1 }
  0xb7   :  { %6251 = vst [vmem:[#allocation3 + $0x110] sm:$0xff] %v5751_v18   ;;  %v3257_v39 = vadd.f32 %v6555_v45, %v1851_v27  ;;  %v3321_v40 = vadd.f32 %v6555_v45, %v2011_v28 }
  0xb8   :  { %vm3640_vm10 = vcmp.ge.f32.partialorder %v3384_v25, 0.0  ;;  %v3896_v31 = vmul.f32 0.2, %v3384_v25  ;;  %vm3704_vm11 = vcmp.ge.f32.partialorder %v3448_v26, 0.0  ;;  %v3960_v32 = vmul.f32 0.2, %v3448_v26 }
  0xb9   :  { %5332 = vmatmul.msk.bf16.gmra.mxu0 %vm1435_vm2, %v5460_v22  ;;  %5364 = vmatmul.msk.bf16.gmra.mxu1 %vm1435_vm2, %v5492_v23  ;;  %v3769_v46 = vmul.f32 0.2, %v3257_v39  ;;  %v3833_v47 = vmul.f32 0.2, %v3321_v40  ;;  %vm3513_vm12 = vcmp.ge.f32.partialorder %v3257_v39, 0.0  ;;  %vm3577_vm13 = vcmp.ge.f32.partialorder %v3321_v40, 0.0 }
  0xba   :  { %v4152_v35 = vsel %vm3640_vm10, %v3384_v25, %v3896_v31  ;;  %v4216_v36 = vsel %vm3704_vm11, %v3448_v26, %v3960_v32  ;;  %5396 = vmatmul.msk.bf16.gmra.mxu2 %vm1435_vm2, %v5524_v29  ;;  %5428 = vmatmul.msk.bf16.gmra.mxu3 %vm1435_vm2, %v5556_v30 }
  0xbb   :  { %v5911_v37 = vpack.c.bf16 %v4152_v35, %v4151_v33  ;;  %v6071_v38 = vpack.c.bf16 %v4216_v36, %v4215_v34  ;;  %v4025_v54 = vsel %vm3513_vm12, %v3257_v39, %v3769_v46  ;;  %v4089_v55 = vsel %vm3577_vm13, %v3321_v40, %v3833_v47  ;;  %v5462_v39 = vld [vmem:[%s7203_s0 + $0x68] sm:$0xff] }
  0xbc   :  { %v5494_v40 = vld [vmem:[%s7203_s0 + $0x168] sm:$0xff] }
  0xbd   :  { %6283 = vst [vmem:[#allocation3 + $0x210] sm:$0xff] %v5911_v37   ;;  %v2171_v41 = vpop.f32.mrf.mxu2  ;;  %v2331_v42 = vpop.f32.mrf.mxu3  ;;  %v5526_v47 = vld [vmem:[%s7203_s0 + $0x268] sm:$0xff] }
  0xbe   :  { %6315 = vst [vmem:[#allocation3 + $0x310] sm:$0xff] %v6071_v38   ;;  %v1853_v43 = vpop.f32.mrf.mxu0  ;;  %v2013_v44 = vpop.f32.mrf.mxu1  ;;  %v3385_v50 = vadd.f32 %v6555_v45, %v2171_v41  ;;  %v3449_v53 = vadd.f32 %v6555_v45, %v2331_v42 }
  0xbf   :  { %v3258_v48 = vadd.f32 %v6555_v45, %v1853_v43  ;;  %v3322_v49 = vadd.f32 %v6555_v45, %v2013_v44 }
  0xc0   :  { %v3897_v60 = vmul.f32 0.2, %v3385_v50  ;;  %vm3641_vm0 = vcmp.ge.f32.partialorder %v3385_v50, 0.0  ;;  %v3961_v1 = vmul.f32 0.2, %v3449_v53  ;;  %vm3705_vm1 = vcmp.ge.f32.partialorder %v3449_v53, 0.0 }
  0xc1   :  { %vm3514_vm14 = vcmp.ge.f32.partialorder %v3258_v48, 0.0  ;;  %v3770_v51 = vmul.f32 0.2, %v3258_v48  ;;  %vm3578_vm15 = vcmp.ge.f32.partialorder %v3322_v49, 0.0  ;;  %v3834_v52 = vmul.f32 0.2, %v3322_v49 }
  0xc2   :  { %v4153_v10 = vsel %vm3641_vm0, %v3385_v50, %v3897_v60  ;;  %v4217_v11 = vsel %vm3705_vm1, %v3449_v53, %v3961_v1 }
  0xc3   :  { %v4026_v56 = vsel %vm3514_vm14, %v3258_v48, %v3770_v51  ;;  %v4090_v57 = vsel %vm3578_vm15, %v3322_v49, %v3834_v52  ;;  %v5558_v48 = vld [vmem:[%s7203_s0 + $0x368] sm:$0xff] }
  0xc4   :  { %v5596_v58 = vpack.c.bf16 %v4026_v56, %v4025_v54  ;;  %v5756_v59 = vpack.c.bf16 %v4090_v57, %v4089_v55 }
  0xc5   :  { %v2173_v61 = vpop.f32.mrf.mxu2  ;;  %v2333_v62 = vpop.f32.mrf.mxu3 }
  0xc6   :  { %6220 = vst [vmem:[#allocation3 + $0x18] sm:$0xff] %v5596_v58   ;;  %v3386_v2 = vadd.f32 %v6555_v45, %v2173_v61  ;;  %v3450_v3 = vadd.f32 %v6555_v45, %v2333_v62  ;;  %v1856_v4 = vpop.f32.mrf.mxu0  ;;  %v2016_v5 = vpop.f32.mrf.mxu1 }
  0xc7   :  { %6252 = vst [vmem:[#allocation3 + $0x118] sm:$0xff] %v5756_v59   ;;  %v3259_v16 = vadd.f32 %v6555_v45, %v1856_v4  ;;  %v3323_v17 = vadd.f32 %v6555_v45, %v2016_v5 }
  0xc8   :  { %vm3642_vm3 = vcmp.ge.f32.partialorder %v3386_v2, 0.0  ;;  %v3898_v8 = vmul.f32 0.2, %v3386_v2  ;;  %vm3706_vm4 = vcmp.ge.f32.partialorder %v3450_v3, 0.0  ;;  %v3962_v9 = vmul.f32 0.2, %v3450_v3 }
  0xc9   :  { %5333 = vmatmul.msk.bf16.gmra.mxu0 %vm1435_vm2, %v5461_v63  ;;  %5365 = vmatmul.msk.bf16.gmra.mxu1 %vm1435_vm2, %v5493_v0  ;;  %v3771_v22 = vmul.f32 0.2, %v3259_v16  ;;  %v3835_v23 = vmul.f32 0.2, %v3323_v17  ;;  %vm3515_vm5 = vcmp.ge.f32.partialorder %v3259_v16, 0.0  ;;  %vm3579_vm6 = vcmp.ge.f32.partialorder %v3323_v17, 0.0 }
  0xca   :  { %v4154_v12 = vsel %vm3642_vm3, %v3386_v2, %v3898_v8  ;;  %v4218_v13 = vsel %vm3706_vm4, %v3450_v3, %v3962_v9  ;;  %5397 = vmatmul.msk.bf16.gmra.mxu2 %vm1435_vm2, %v5525_v6  ;;  %5429 = vmatmul.msk.bf16.gmra.mxu3 %vm1435_vm2, %v5557_v7 }
  0xcb   :  { %v5916_v14 = vpack.c.bf16 %v4154_v12, %v4153_v10  ;;  %v6076_v15 = vpack.c.bf16 %v4218_v13, %v4217_v11  ;;  %v4027_v30 = vsel %vm3515_vm5, %v3259_v16, %v3771_v22  ;;  %v4091_v31 = vsel %vm3579_vm6, %v3323_v17, %v3835_v23  ;;  %v5463_v16 = vld [vmem:[%s7203_s0 + $0x70] sm:$0xff] }
  0xcc   :  { %v5495_v17 = vld [vmem:[%s7203_s0 + $0x170] sm:$0xff] }
  0xcd   :  { %6284 = vst [vmem:[#allocation3 + $0x218] sm:$0xff] %v5916_v14   ;;  %v2176_v18 = vpop.f32.mrf.mxu2  ;;  %v2336_v19 = vpop.f32.mrf.mxu3  ;;  %v5527_v23 = vld [vmem:[%s7203_s0 + $0x270] sm:$0xff] }
  0xce   :  { %6316 = vst [vmem:[#allocation3 + $0x318] sm:$0xff] %v6076_v15   ;;  %v1858_v20 = vpop.f32.mrf.mxu0  ;;  %v2018_v21 = vpop.f32.mrf.mxu1  ;;  %v3387_v26 = vadd.f32 %v6555_v45, %v2176_v18  ;;  %v3451_v29 = vadd.f32 %v6555_v45, %v2336_v19 }
  0xcf   :  { %v3260_v24 = vadd.f32 %v6555_v45, %v1858_v20  ;;  %v3324_v25 = vadd.f32 %v6555_v45, %v2018_v21 }
  0xd0   :  { %v3899_v36 = vmul.f32 0.2, %v3387_v26  ;;  %vm3643_vm9 = vcmp.ge.f32.partialorder %v3387_v26, 0.0  ;;  %v3963_v41 = vmul.f32 0.2, %v3451_v29  ;;  %vm3707_vm10 = vcmp.ge.f32.partialorder %v3451_v29, 0.0 }
  0xd1   :  { %vm3516_vm7 = vcmp.ge.f32.partialorder %v3260_v24, 0.0  ;;  %v3772_v27 = vmul.f32 0.2, %v3260_v24  ;;  %vm3580_vm8 = vcmp.ge.f32.partialorder %v3324_v25, 0.0  ;;  %v3836_v28 = vmul.f32 0.2, %v3324_v25 }
  0xd2   :  { %v4155_v51 = vsel %vm3643_vm9, %v3387_v26, %v3899_v36  ;;  %v4219_v52 = vsel %vm3707_vm10, %v3451_v29, %v3963_v41 }
  0xd3   :  { %v4028_v32 = vsel %vm3516_vm7, %v3260_v24, %v3772_v27  ;;  %v4092_v33 = vsel %vm3580_vm8, %v3324_v25, %v3836_v28  ;;  %v5559_v24 = vld [vmem:[%s7203_s0 + $0x370] sm:$0xff] }
  0xd4   :  { %v5601_v34 = vpack.c.bf16 %v4028_v32, %v4027_v30  ;;  %v5761_v35 = vpack.c.bf16 %v4092_v33, %v4091_v31 }
  0xd5   :  { %v2178_v37 = vpop.f32.mrf.mxu2  ;;  %v2338_v38 = vpop.f32.mrf.mxu3 }
  0xd6   :  { %6221 = vst [vmem:[#allocation3 + $0x20] sm:$0xff] %v5601_v34   ;;  %v3388_v42 = vadd.f32 %v6555_v45, %v2178_v37  ;;  %v3452_v43 = vadd.f32 %v6555_v45, %v2338_v38  ;;  %v1861_v44 = vpop.f32.mrf.mxu0  ;;  %v2021_v46 = vpop.f32.mrf.mxu1 }
  0xd7   :  { %6253 = vst [vmem:[#allocation3 + $0x120] sm:$0xff] %v5761_v35   ;;  %v3261_v57 = vadd.f32 %v6555_v45, %v1861_v44  ;;  %v3325_v58 = vadd.f32 %v6555_v45, %v2021_v46 }
  0xd8   :  { %vm3644_vm11 = vcmp.ge.f32.partialorder %v3388_v42, 0.0  ;;  %v3900_v49 = vmul.f32 0.2, %v3388_v42  ;;  %vm3708_vm12 = vcmp.ge.f32.partialorder %v3452_v43, 0.0  ;;  %v3964_v50 = vmul.f32 0.2, %v3452_v43 }
  0xd9   :  { %5334 = vmatmul.msk.bf16.gmra.mxu0 %vm1435_vm2, %v5462_v39  ;;  %5366 = vmatmul.msk.bf16.gmra.mxu1 %vm1435_vm2, %v5494_v40  ;;  %v3773_v63 = vmul.f32 0.2, %v3261_v57  ;;  %v3837_v0 = vmul.f32 0.2, %v3325_v58  ;;  %vm3517_vm13 = vcmp.ge.f32.partialorder %v3261_v57, 0.0  ;;  %vm3581_vm14 = vcmp.ge.f32.partialorder %v3325_v58, 0.0 }
  0xda   :  { %v4156_v53 = vsel %vm3644_vm11, %v3388_v42, %v3900_v49  ;;  %v4220_v54 = vsel %vm3708_vm12, %v3452_v43, %v3964_v50  ;;  %5398 = vmatmul.msk.bf16.gmra.mxu2 %vm1435_vm2, %v5526_v47  ;;  %5430 = vmatmul.msk.bf16.gmra.mxu3 %vm1435_vm2, %v5558_v48 }
  0xdb   :  { %v5921_v55 = vpack.c.bf16 %v4156_v53, %v4155_v51  ;;  %v6081_v56 = vpack.c.bf16 %v4220_v54, %v4219_v52  ;;  %v4029_v7 = vsel %vm3517_vm13, %v3261_v57, %v3773_v63  ;;  %v4093_v8 = vsel %vm3581_vm14, %v3325_v58, %v3837_v0  ;;  %v5464_v57 = vld [vmem:[%s7203_s0 + $0x78] sm:$0xff] }
  0xdc   :  { %v5496_v58 = vld [vmem:[%s7203_s0 + $0x178] sm:$0xff] }
  0xdd   :  { %6285 = vst [vmem:[#allocation3 + $0x220] sm:$0xff] %v5921_v55   ;;  %v2181_v59 = vpop.f32.mrf.mxu2  ;;  %v2341_v60 = vpop.f32.mrf.mxu3  ;;  %v5528_v0 = vld [vmem:[%s7203_s0 + $0x278] sm:$0xff] }
  0xde   :  { %6317 = vst [vmem:[#allocation3 + $0x320] sm:$0xff] %v6081_v56   ;;  %v1863_v61 = vpop.f32.mrf.mxu0  ;;  %v2023_v62 = vpop.f32.mrf.mxu1  ;;  %v3389_v3 = vadd.f32 %v6555_v45, %v2181_v59  ;;  %v3453_v6 = vadd.f32 %v6555_v45, %v2341_v60 }
  0xdf   :  { %v3262_v1 = vadd.f32 %v6555_v45, %v1863_v61  ;;  %v3326_v2 = vadd.f32 %v6555_v45, %v2023_v62 }
  0xe0   :  { %v3901_v13 = vmul.f32 0.2, %v3389_v3  ;;  %vm3645_vm1 = vcmp.ge.f32.partialorder %v3389_v3, 0.0  ;;  %v3965_v18 = vmul.f32 0.2, %v3453_v6  ;;  %vm3709_vm3 = vcmp.ge.f32.partialorder %v3453_v6, 0.0 }
  0xe1   :  { %vm3518_vm15 = vcmp.ge.f32.partialorder %v3262_v1, 0.0  ;;  %v3774_v4 = vmul.f32 0.2, %v3262_v1  ;;  %vm3582_vm0 = vcmp.ge.f32.partialorder %v3326_v2, 0.0  ;;  %v3838_v5 = vmul.f32 0.2, %v3326_v2 }
  0xe2   :  { %v4157_v27 = vsel %vm3645_vm1, %v3389_v3, %v3901_v13  ;;  %v4221_v28 = vsel %vm3709_vm3, %v3453_v6, %v3965_v18 }
  0xe3   :  { %v4030_v9 = vsel %vm3518_vm15, %v3262_v1, %v3774_v4  ;;  %v4094_v10 = vsel %vm3582_vm0, %v3326_v2, %v3838_v5  ;;  %v5560_v1 = vld [vmem:[%s7203_s0 + $0x378] sm:$0xff] }
  0xe4   :  { %v5606_v11 = vpack.c.bf16 %v4030_v9, %v4029_v7  ;;  %v5766_v12 = vpack.c.bf16 %v4094_v10, %v4093_v8 }
  0xe5   :  { %v2183_v14 = vpop.f32.mrf.mxu2  ;;  %v2343_v15 = vpop.f32.mrf.mxu3 }
  0xe6   :  { %6222 = vst [vmem:[#allocation3 + $0x28] sm:$0xff] %v5606_v11   ;;  %v3390_v19 = vadd.f32 %v6555_v45, %v2183_v14  ;;  %v3454_v20 = vadd.f32 %v6555_v45, %v2343_v15  ;;  %v1866_v21 = vpop.f32.mrf.mxu0  ;;  %v2026_v22 = vpop.f32.mrf.mxu1 }
  0xe7   :  { %6254 = vst [vmem:[#allocation3 + $0x128] sm:$0xff] %v5766_v12   ;;  %v3263_v33 = vadd.f32 %v6555_v45, %v1866_v21  ;;  %v3327_v34 = vadd.f32 %v6555_v45, %v2026_v22 }
  0xe8   :  { %vm3646_vm4 = vcmp.ge.f32.partialorder %v3390_v19, 0.0  ;;  %v3902_v25 = vmul.f32 0.2, %v3390_v19  ;;  %vm3710_vm5 = vcmp.ge.f32.partialorder %v3454_v20, 0.0  ;;  %v3966_v26 = vmul.f32 0.2, %v3454_v20 }
  0xe9   :  { %5335 = vmatmul.msk.bf16.gmra.mxu0 %vm1435_vm2, %v5463_v16  ;;  %5367 = vmatmul.msk.bf16.gmra.mxu1 %vm1435_vm2, %v5495_v17  ;;  %v3775_v39 = vmul.f32 0.2, %v3263_v33  ;;  %v3839_v40 = vmul.f32 0.2, %v3327_v34  ;;  %vm3519_vm6 = vcmp.ge.f32.partialorder %v3263_v33, 0.0  ;;  %vm3583_vm7 = vcmp.ge.f32.partialorder %v3327_v34, 0.0 }
  0xea   :  { %v4158_v29 = vsel %vm3646_vm4, %v3390_v19, %v3902_v25  ;;  %v4222_v30 = vsel %vm3710_vm5, %v3454_v20, %v3966_v26  ;;  %5399 = vmatmul.msk.bf16.gmra.mxu2 %vm1435_vm2, %v5527_v23  ;;  %5431 = vmatmul.msk.bf16.gmra.mxu3 %vm1435_vm2, %v5559_v24 }
  0xeb   :  { %v5926_v31 = vpack.c.bf16 %v4158_v29, %v4157_v27  ;;  %v6086_v32 = vpack.c.bf16 %v4222_v30, %v4221_v28  ;;  %v4031_v48 = vsel %vm3519_vm6, %v3263_v33, %v3775_v39  ;;  %v4095_v49 = vsel %vm3583_vm7, %v3327_v34, %v3839_v40  ;;  %v5465_v33 = vld [vmem:[%s7203_s0 + $0x80] sm:$0xff] }
  0xec   :  { %v5497_v34 = vld [vmem:[%s7203_s0 + $0x180] sm:$0xff] }
  0xed   :  { %6286 = vst [vmem:[#allocation3 + $0x228] sm:$0xff] %v5926_v31   ;;  %v2186_v35 = vpop.f32.mrf.mxu2  ;;  %v2346_v36 = vpop.f32.mrf.mxu3  ;;  %v5529_v40 = vld [vmem:[%s7203_s0 + $0x280] sm:$0xff] }
  0xee   :  { %6318 = vst [vmem:[#allocation3 + $0x328] sm:$0xff] %v6086_v32   ;;  %v1868_v37 = vpop.f32.mrf.mxu0  ;;  %v2028_v38 = vpop.f32.mrf.mxu1  ;;  %v3391_v43 = vadd.f32 %v6555_v45, %v2186_v35  ;;  %v3455_v47 = vadd.f32 %v6555_v45, %v2346_v36 }
  0xef   :  { %v3264_v41 = vadd.f32 %v6555_v45, %v1868_v37  ;;  %v3328_v42 = vadd.f32 %v6555_v45, %v2028_v38 }
  0xf0   :  { %v3903_v54 = vmul.f32 0.2, %v3391_v43  ;;  %vm3647_vm10 = vcmp.ge.f32.partialorder %v3391_v43, 0.0  ;;  %v3967_v59 = vmul.f32 0.2, %v3455_v47  ;;  %vm3711_vm11 = vcmp.ge.f32.partialorder %v3455_v47, 0.0 }
  0xf1   :  { %vm3520_vm8 = vcmp.ge.f32.partialorder %v3264_v41, 0.0  ;;  %v3776_v44 = vmul.f32 0.2, %v3264_v41  ;;  %vm3584_vm9 = vcmp.ge.f32.partialorder %v3328_v42, 0.0  ;;  %v3840_v46 = vmul.f32 0.2, %v3328_v42 }
  0xf2   :  { %v4159_v4 = vsel %vm3647_vm10, %v3391_v43, %v3903_v54  ;;  %v4223_v5 = vsel %vm3711_vm11, %v3455_v47, %v3967_v59 }
  0xf3   :  { %v4032_v50 = vsel %vm3520_vm8, %v3264_v41, %v3776_v44  ;;  %v4096_v51 = vsel %vm3584_vm9, %v3328_v42, %v3840_v46  ;;  %v5561_v41 = vld [vmem:[%s7203_s0 + $0x380] sm:$0xff] }
  0xf4   :  { %v5611_v52 = vpack.c.bf16 %v4032_v50, %v4031_v48  ;;  %v5771_v53 = vpack.c.bf16 %v4096_v51, %v4095_v49 }
  0xf5   :  { %v2188_v55 = vpop.f32.mrf.mxu2  ;;  %v2348_v56 = vpop.f32.mrf.mxu3 }
  0xf6   :  { %6223 = vst [vmem:[#allocation3 + $0x30] sm:$0xff] %v5611_v52   ;;  %v3392_v60 = vadd.f32 %v6555_v45, %v2188_v55  ;;  %v3456_v61 = vadd.f32 %v6555_v45, %v2348_v56  ;;  %v1871_v62 = vpop.f32.mrf.mxu0  ;;  %v2031_v63 = vpop.f32.mrf.mxu1 }
  0xf7   :  { %6255 = vst [vmem:[#allocation3 + $0x130] sm:$0xff] %v5771_v53   ;;  %v3265_v10 = vadd.f32 %v6555_v45, %v1871_v62  ;;  %v3329_v11 = vadd.f32 %v6555_v45, %v2031_v63 }
  0xf8   :  { %vm3648_vm12 = vcmp.ge.f32.partialorder %v3392_v60, 0.0  ;;  %v3904_v2 = vmul.f32 0.2, %v3392_v60  ;;  %vm3712_vm13 = vcmp.ge.f32.partialorder %v3456_v61, 0.0  ;;  %v3968_v3 = vmul.f32 0.2, %v3456_v61 }
  0xf9   :  { %5336 = vmatmul.msk.bf16.gmra.mxu0 %vm1435_vm2, %v5464_v57  ;;  %5368 = vmatmul.msk.bf16.gmra.mxu1 %vm1435_vm2, %v5496_v58  ;;  %v3777_v16 = vmul.f32 0.2, %v3265_v10  ;;  %v3841_v17 = vmul.f32 0.2, %v3329_v11  ;;  %vm3521_vm14 = vcmp.ge.f32.partialorder %v3265_v10, 0.0  ;;  %vm3585_vm15 = vcmp.ge.f32.partialorder %v3329_v11, 0.0 }
  0xfa   :  { %v4160_v6 = vsel %vm3648_vm12, %v3392_v60, %v3904_v2  ;;  %v4224_v7 = vsel %vm3712_vm13, %v3456_v61, %v3968_v3  ;;  %5400 = vmatmul.msk.bf16.gmra.mxu2 %vm1435_vm2, %v5528_v0  ;;  %5432 = vmatmul.msk.bf16.gmra.mxu3 %vm1435_vm2, %v5560_v1 }
  0xfb   :  { %v5931_v8 = vpack.c.bf16 %v4160_v6, %v4159_v4  ;;  %v6091_v9 = vpack.c.bf16 %v4224_v7, %v4223_v5  ;;  %v4033_v24 = vsel %vm3521_vm14, %v3265_v10, %v3777_v16  ;;  %v4097_v25 = vsel %vm3585_vm15, %v3329_v11, %v3841_v17  ;;  %v5466_v10 = vld [vmem:[%s7203_s0 + $0x88] sm:$0xff] }
  0xfc   :  { %v5498_v11 = vld [vmem:[%s7203_s0 + $0x188] sm:$0xff] }
  0xfd   :  { %6287 = vst [vmem:[#allocation3 + $0x230] sm:$0xff] %v5931_v8   ;;  %v2191_v12 = vpop.f32.mrf.mxu2  ;;  %v2351_v13 = vpop.f32.mrf.mxu3  ;;  %v5530_v17 = vld [vmem:[%s7203_s0 + $0x288] sm:$0xff] }
  0xfe   :  { %6319 = vst [vmem:[#allocation3 + $0x330] sm:$0xff] %v6091_v9   ;;  %v1873_v14 = vpop.f32.mrf.mxu0  ;;  %v2033_v15 = vpop.f32.mrf.mxu1  ;;  %v3393_v20 = vadd.f32 %v6555_v45, %v2191_v12  ;;  %v3457_v23 = vadd.f32 %v6555_v45, %v2351_v13 }
  0xff   :  { %v3266_v18 = vadd.f32 %v6555_v45, %v1873_v14  ;;  %v3330_v19 = vadd.f32 %v6555_v45, %v2033_v15 }
 0x100   :  { %v3905_v30 = vmul.f32 0.2, %v3393_v20  ;;  %vm3649_vm3 = vcmp.ge.f32.partialorder %v3393_v20, 0.0  ;;  %v3969_v35 = vmul.f32 0.2, %v3457_v23  ;;  %vm3713_vm4 = vcmp.ge.f32.partialorder %v3457_v23, 0.0 }
 0x101   :  { %vm3522_vm0 = vcmp.ge.f32.partialorder %v3266_v18, 0.0  ;;  %v3778_v21 = vmul.f32 0.2, %v3266_v18  ;;  %vm3586_vm1 = vcmp.ge.f32.partialorder %v3330_v19, 0.0  ;;  %v3842_v22 = vmul.f32 0.2, %v3330_v19 }
 0x102   :  { %v4161_v44 = vsel %vm3649_vm3, %v3393_v20, %v3905_v30  ;;  %v4225_v46 = vsel %vm3713_vm4, %v3457_v23, %v3969_v35  ;;  %v6782_v35 = vld [vmem:[%s7205_s2] ss:$0 sm:$0xff] }
 0x103   :  { %v4034_v26 = vsel %vm3522_vm0, %v3266_v18, %v3778_v21  ;;  %v4098_v27 = vsel %vm3586_vm1, %v3330_v19, %v3842_v22  ;;  %v5562_v18 = vld [vmem:[%s7203_s0 + $0x388] sm:$0xff] }
 0x104   :  { %v5616_v28 = vpack.c.bf16 %v4034_v26, %v4033_v24  ;;  %v5776_v29 = vpack.c.bf16 %v4098_v27, %v4097_v25 }
 0x105   :  { %v2193_v31 = vpop.f32.mrf.mxu2  ;;  %v2353_v32 = vpop.f32.mrf.mxu3 }
 0x106   :  { %6224 = vst [vmem:[#allocation3 + $0x38] sm:$0xff] %v5616_v28   ;;  %v3394_v36 = vadd.f32 %v6555_v45, %v2193_v31  ;;  %v3458_v37 = vadd.f32 %v6555_v45, %v2353_v32  ;;  %v1876_v38 = vpop.f32.mrf.mxu0  ;;  %v2036_v39 = vpop.f32.mrf.mxu1 }
 0x107   :  { %6256 = vst [vmem:[#allocation3 + $0x138] sm:$0xff] %v5776_v29   ;;  %v3267_v51 = vadd.f32 %v6555_v45, %v1876_v38  ;;  %v3331_v52 = vadd.f32 %v6555_v45, %v2036_v39 }
 0x108   :  { %vm3650_vm5 = vcmp.ge.f32.partialorder %v3394_v36, 0.0  ;;  %v3906_v42 = vmul.f32 0.2, %v3394_v36  ;;  %vm3714_vm6 = vcmp.ge.f32.partialorder %v3458_v37, 0.0  ;;  %v3970_v43 = vmul.f32 0.2, %v3458_v37 }
 0x109   :  { %5337 = vmatmul.msk.bf16.gmra.mxu0 %vm1435_vm2, %v5465_v33  ;;  %5369 = vmatmul.msk.bf16.gmra.mxu1 %vm1435_vm2, %v5497_v34  ;;  %v3779_v57 = vmul.f32 0.2, %v3267_v51  ;;  %v3843_v58 = vmul.f32 0.2, %v3331_v52  ;;  %vm3523_vm7 = vcmp.ge.f32.partialorder %v3267_v51, 0.0  ;;  %vm3587_vm8 = vcmp.ge.f32.partialorder %v3331_v52, 0.0 }
 0x10a   :  { %v4162_v47 = vsel %vm3650_vm5, %v3394_v36, %v3906_v42  ;;  %v4226_v48 = vsel %vm3714_vm6, %v3458_v37, %v3970_v43  ;;  %5401 = vmatmul.msk.bf16.gmra.mxu2 %vm1435_vm2, %v5529_v40  ;;  %5433 = vmatmul.msk.bf16.gmra.mxu3 %vm1435_vm2, %v5561_v41 }
 0x10b   :  { %v5936_v49 = vpack.c.bf16 %v4162_v47, %v4161_v44  ;;  %v6096_v50 = vpack.c.bf16 %v4226_v48, %v4225_v46  ;;  %v4035_v1 = vsel %vm3523_vm7, %v3267_v51, %v3779_v57  ;;  %v4099_v2 = vsel %vm3587_vm8, %v3331_v52, %v3843_v58  ;;  %v5467_v51 = vld [vmem:[%s7203_s0 + $0x90] sm:$0xff] }
 0x10c   :  { %v5499_v52 = vld [vmem:[%s7203_s0 + $0x190] sm:$0xff] }
 0x10d   :  { %6288 = vst [vmem:[#allocation3 + $0x238] sm:$0xff] %v5936_v49   ;;  %v2196_v53 = vpop.f32.mrf.mxu2  ;;  %v2356_v54 = vpop.f32.mrf.mxu3  ;;  %v5531_v58 = vld [vmem:[%s7203_s0 + $0x290] sm:$0xff] }
 0x10e   :  { %6320 = vst [vmem:[#allocation3 + $0x338] sm:$0xff] %v6096_v50   ;;  %v1878_v55 = vpop.f32.mrf.mxu0  ;;  %v2038_v56 = vpop.f32.mrf.mxu1  ;;  %v3395_v61 = vadd.f32 %v6555_v45, %v2196_v53  ;;  %v3459_v0 = vadd.f32 %v6555_v45, %v2356_v54 }
 0x10f   :  { %v3268_v59 = vadd.f32 %v6555_v45, %v1878_v55  ;;  %v3332_v60 = vadd.f32 %v6555_v45, %v2038_v56 }
 0x110   :  { %v3907_v7 = vmul.f32 0.2, %v3395_v61  ;;  %vm3651_vm11 = vcmp.ge.f32.partialorder %v3395_v61, 0.0  ;;  %v3971_v12 = vmul.f32 0.2, %v3459_v0  ;;  %vm3715_vm12 = vcmp.ge.f32.partialorder %v3459_v0, 0.0 }
 0x111   :  { %vm3524_vm9 = vcmp.ge.f32.partialorder %v3268_v59, 0.0  ;;  %v3780_v62 = vmul.f32 0.2, %v3268_v59  ;;  %vm3588_vm10 = vcmp.ge.f32.partialorder %v3332_v60, 0.0  ;;  %v3844_v63 = vmul.f32 0.2, %v3332_v60 }
 0x112   :  { %v4163_v21 = vsel %vm3651_vm11, %v3395_v61, %v3907_v7  ;;  %v4227_v22 = vsel %vm3715_vm12, %v3459_v0, %v3971_v12 }
 0x113   :  { %v4036_v3 = vsel %vm3524_vm9, %v3268_v59, %v3780_v62  ;;  %v4100_v4 = vsel %vm3588_vm10, %v3332_v60, %v3844_v63  ;;  %v5563_v59 = vld [vmem:[%s7203_s0 + $0x390] sm:$0xff] }
 0x114   :  { %v5621_v5 = vpack.c.bf16 %v4036_v3, %v4035_v1  ;;  %v5781_v6 = vpack.c.bf16 %v4100_v4, %v4099_v2 }
 0x115   :  { %v2198_v8 = vpop.f32.mrf.mxu2  ;;  %v2358_v9 = vpop.f32.mrf.mxu3 }
 0x116   :  { %6225 = vst [vmem:[#allocation3 + $0x40] sm:$0xff] %v5621_v5   ;;  %v3396_v13 = vadd.f32 %v6555_v45, %v2198_v8  ;;  %v3460_v14 = vadd.f32 %v6555_v45, %v2358_v9  ;;  %v1881_v15 = vpop.f32.mrf.mxu0  ;;  %v2041_v16 = vpop.f32.mrf.mxu1 }
 0x117   :  { %6257 = vst [vmem:[#allocation3 + $0x140] sm:$0xff] %v5781_v6   ;;  %v3269_v27 = vadd.f32 %v6555_v45, %v1881_v15  ;;  %v3333_v28 = vadd.f32 %v6555_v45, %v2041_v16 }
 0x118   :  { %vm3652_vm13 = vcmp.ge.f32.partialorder %v3396_v13, 0.0  ;;  %v3908_v19 = vmul.f32 0.2, %v3396_v13  ;;  %vm3716_vm14 = vcmp.ge.f32.partialorder %v3460_v14, 0.0  ;;  %v3972_v20 = vmul.f32 0.2, %v3460_v14 }
 0x119   :  { %5338 = vmatmul.msk.bf16.gmra.mxu0 %vm1435_vm2, %v5466_v10  ;;  %5370 = vmatmul.msk.bf16.gmra.mxu1 %vm1435_vm2, %v5498_v11  ;;  %v3781_v33 = vmul.f32 0.2, %v3269_v27  ;;  %v3845_v34 = vmul.f32 0.2, %v3333_v28  ;;  %vm3525_vm15 = vcmp.ge.f32.partialorder %v3269_v27, 0.0  ;;  %vm3589_vm0 = vcmp.ge.f32.partialorder %v3333_v28, 0.0 }
 0x11a   :  { %v4164_v23 = vsel %vm3652_vm13, %v3396_v13, %v3908_v19  ;;  %v4228_v24 = vsel %vm3716_vm14, %v3460_v14, %v3972_v20  ;;  %5402 = vmatmul.msk.bf16.gmra.mxu2 %vm1435_vm2, %v5530_v17  ;;  %5434 = vmatmul.msk.bf16.gmra.mxu3 %vm1435_vm2, %v5562_v18 }
 0x11b   :  { %v5941_v25 = vpack.c.bf16 %v4164_v23, %v4163_v21  ;;  %v6101_v26 = vpack.c.bf16 %v4228_v24, %v4227_v22  ;;  %v4037_v41 = vsel %vm3525_vm15, %v3269_v27, %v3781_v33  ;;  %v4101_v42 = vsel %vm3589_vm0, %v3333_v28, %v3845_v34  ;;  %v5468_v27 = vld [vmem:[%s7203_s0 + $0x98] sm:$0xff] }
 0x11c   :  { %v5500_v28 = vld [vmem:[%s7203_s0 + $0x198] sm:$0xff] }
 0x11d   :  { %6289 = vst [vmem:[#allocation3 + $0x240] sm:$0xff] %v5941_v25   ;;  %v2201_v29 = vpop.f32.mrf.mxu2  ;;  %v2361_v30 = vpop.f32.mrf.mxu3  ;;  %v5532_v34 = vld [vmem:[%s7203_s0 + $0x298] sm:$0xff] }
 0x11e   :  { %6321 = vst [vmem:[#allocation3 + $0x340] sm:$0xff] %v6101_v26   ;;  %v1883_v31 = vpop.f32.mrf.mxu0  ;;  %v2043_v32 = vpop.f32.mrf.mxu1  ;;  %v3397_v45 = vadd.f32 %v6782_v35, %v2201_v29  ;;  %v3461_v40 = vadd.f32 %v6782_v35, %v2361_v30 }
 0x11f   :  { %v3270_v36 = vadd.f32 %v6782_v35, %v1883_v31  ;;  %v3334_v37 = vadd.f32 %v6782_v35, %v2043_v32 }
 0x120   :  { %v3909_v48 = vmul.f32 0.2, %v3397_v45  ;;  %vm3653_vm4 = vcmp.ge.f32.partialorder %v3397_v45, 0.0  ;;  %v3973_v53 = vmul.f32 0.2, %v3461_v40  ;;  %vm3717_vm5 = vcmp.ge.f32.partialorder %v3461_v40, 0.0 }
 0x121   :  { %vm3526_vm1 = vcmp.ge.f32.partialorder %v3270_v36, 0.0  ;;  %v3782_v38 = vmul.f32 0.2, %v3270_v36  ;;  %vm3590_vm3 = vcmp.ge.f32.partialorder %v3334_v37, 0.0  ;;  %v3846_v39 = vmul.f32 0.2, %v3334_v37 }
 0x122   :  { %v4165_v62 = vsel %vm3653_vm4, %v3397_v45, %v3909_v48  ;;  %v4229_v63 = vsel %vm3717_vm5, %v3461_v40, %v3973_v53 }
 0x123   :  { %v4038_v43 = vsel %vm3526_vm1, %v3270_v36, %v3782_v38  ;;  %v4102_v44 = vsel %vm3590_vm3, %v3334_v37, %v3846_v39  ;;  %v5564_v36 = vld [vmem:[%s7203_s0 + $0x398] sm:$0xff] }
 0x124   :  { %v5626_v46 = vpack.c.bf16 %v4038_v43, %v4037_v41  ;;  %v5786_v47 = vpack.c.bf16 %v4102_v44, %v4101_v42 }
 0x125   :  { %v2203_v49 = vpop.f32.mrf.mxu2  ;;  %v2363_v50 = vpop.f32.mrf.mxu3 }
 0x126   :  { %6226 = vst [vmem:[#allocation3 + $0x48] sm:$0xff] %v5626_v46   ;;  %v3398_v54 = vadd.f32 %v6782_v35, %v2203_v49  ;;  %v3462_v55 = vadd.f32 %v6782_v35, %v2363_v50  ;;  %v1886_v56 = vpop.f32.mrf.mxu0  ;;  %v2046_v57 = vpop.f32.mrf.mxu1 }
 0x127   :  { %6258 = vst [vmem:[#allocation3 + $0x148] sm:$0xff] %v5786_v47   ;;  %v3271_v4 = vadd.f32 %v6782_v35, %v1886_v56  ;;  %v3335_v5 = vadd.f32 %v6782_v35, %v2046_v57 }
 0x128   :  { %vm3654_vm6 = vcmp.ge.f32.partialorder %v3398_v54, 0.0  ;;  %v3910_v60 = vmul.f32 0.2, %v3398_v54  ;;  %vm3718_vm7 = vcmp.ge.f32.partialorder %v3462_v55, 0.0  ;;  %v3974_v61 = vmul.f32 0.2, %v3462_v55 }
 0x129   :  { %5339 = vmatmul.msk.bf16.gmra.mxu0 %vm1435_vm2, %v5467_v51  ;;  %5371 = vmatmul.msk.bf16.gmra.mxu1 %vm1435_vm2, %v5499_v52  ;;  %v3783_v10 = vmul.f32 0.2, %v3271_v4  ;;  %v3847_v11 = vmul.f32 0.2, %v3335_v5  ;;  %vm3527_vm8 = vcmp.ge.f32.partialorder %v3271_v4, 0.0  ;;  %vm3591_vm9 = vcmp.ge.f32.partialorder %v3335_v5, 0.0 }
 0x12a   :  { %v4166_v0 = vsel %vm3654_vm6, %v3398_v54, %v3910_v60  ;;  %v4230_v1 = vsel %vm3718_vm7, %v3462_v55, %v3974_v61  ;;  %5403 = vmatmul.msk.bf16.gmra.mxu2 %vm1435_vm2, %v5531_v58  ;;  %5435 = vmatmul.msk.bf16.gmra.mxu3 %vm1435_vm2, %v5563_v59 }
 0x12b   :  { %v5946_v2 = vpack.c.bf16 %v4166_v0, %v4165_v62  ;;  %v6106_v3 = vpack.c.bf16 %v4230_v1, %v4229_v63  ;;  %v4039_v18 = vsel %vm3527_vm8, %v3271_v4, %v3783_v10  ;;  %v4103_v19 = vsel %vm3591_vm9, %v3335_v5, %v3847_v11  ;;  %v5469_v4 = vld [vmem:[%s7203_s0 + $0xa0] sm:$0xff] }
 0x12c   :  { %v5501_v5 = vld [vmem:[%s7203_s0 + $0x1a0] sm:$0xff] }
 0x12d   :  { %6290 = vst [vmem:[#allocation3 + $0x248] sm:$0xff] %v5946_v2   ;;  %v2206_v6 = vpop.f32.mrf.mxu2  ;;  %v2366_v7 = vpop.f32.mrf.mxu3  ;;  %v5533_v11 = vld [vmem:[%s7203_s0 + $0x2a0] sm:$0xff] }
 0x12e   :  { %6322 = vst [vmem:[#allocation3 + $0x348] sm:$0xff] %v6106_v3   ;;  %v1888_v8 = vpop.f32.mrf.mxu0  ;;  %v2048_v9 = vpop.f32.mrf.mxu1  ;;  %v3399_v14 = vadd.f32 %v6782_v35, %v2206_v6  ;;  %v3463_v17 = vadd.f32 %v6782_v35, %v2366_v7 }
 0x12f   :  { %v3272_v12 = vadd.f32 %v6782_v35, %v1888_v8  ;;  %v3336_v13 = vadd.f32 %v6782_v35, %v2048_v9 }
 0x130   :  { %v3911_v24 = vmul.f32 0.2, %v3399_v14  ;;  %vm3655_vm12 = vcmp.ge.f32.partialorder %v3399_v14, 0.0  ;;  %v3975_v29 = vmul.f32 0.2, %v3463_v17  ;;  %vm3719_vm13 = vcmp.ge.f32.partialorder %v3463_v17, 0.0 }
 0x131   :  { %vm3528_vm10 = vcmp.ge.f32.partialorder %v3272_v12, 0.0  ;;  %v3784_v15 = vmul.f32 0.2, %v3272_v12  ;;  %vm3592_vm11 = vcmp.ge.f32.partialorder %v3336_v13, 0.0  ;;  %v3848_v16 = vmul.f32 0.2, %v3336_v13 }
 0x132   :  { %v4167_v38 = vsel %vm3655_vm12, %v3399_v14, %v3911_v24  ;;  %v4231_v39 = vsel %vm3719_vm13, %v3463_v17, %v3975_v29 }
 0x133   :  { %v4040_v20 = vsel %vm3528_vm10, %v3272_v12, %v3784_v15  ;;  %v4104_v21 = vsel %vm3592_vm11, %v3336_v13, %v3848_v16  ;;  %v5565_v12 = vld [vmem:[%s7203_s0 + $0x3a0] sm:$0xff] }
 0x134   :  { %v5631_v22 = vpack.c.bf16 %v4040_v20, %v4039_v18  ;;  %v5791_v23 = vpack.c.bf16 %v4104_v21, %v4103_v19 }
 0x135   :  { %v2208_v25 = vpop.f32.mrf.mxu2  ;;  %v2368_v26 = vpop.f32.mrf.mxu3 }
 0x136   :  { %6227 = vst [vmem:[#allocation3 + $0x50] sm:$0xff] %v5631_v22   ;;  %v3400_v30 = vadd.f32 %v6782_v35, %v2208_v25  ;;  %v3464_v31 = vadd.f32 %v6782_v35, %v2368_v26  ;;  %v1891_v32 = vpop.f32.mrf.mxu0  ;;  %v2051_v33 = vpop.f32.mrf.mxu1 }
 0x137   :  { %6259 = vst [vmem:[#allocation3 + $0x150] sm:$0xff] %v5791_v23   ;;  %v3273_v44 = vadd.f32 %v6782_v35, %v1891_v32  ;;  %v3337_v46 = vadd.f32 %v6782_v35, %v2051_v33 }
 0x138   :  { %vm3656_vm14 = vcmp.ge.f32.partialorder %v3400_v30, 0.0  ;;  %v3912_v37 = vmul.f32 0.2, %v3400_v30  ;;  %vm3720_vm15 = vcmp.ge.f32.partialorder %v3464_v31, 0.0  ;;  %v3976_v45 = vmul.f32 0.2, %v3464_v31 }
 0x139   :  { %5340 = vmatmul.msk.bf16.gmra.mxu0 %vm1435_vm2, %v5468_v27  ;;  %5372 = vmatmul.msk.bf16.gmra.mxu1 %vm1435_vm2, %v5500_v28  ;;  %v3785_v51 = vmul.f32 0.2, %v3273_v44  ;;  %v3849_v52 = vmul.f32 0.2, %v3337_v46  ;;  %vm3529_vm0 = vcmp.ge.f32.partialorder %v3273_v44, 0.0  ;;  %vm3593_vm1 = vcmp.ge.f32.partialorder %v3337_v46, 0.0 }
 0x13a   :  { %v4168_v40 = vsel %vm3656_vm14, %v3400_v30, %v3912_v37  ;;  %v4232_v41 = vsel %vm3720_vm15, %v3464_v31, %v3976_v45  ;;  %5404 = vmatmul.msk.bf16.gmra.mxu2 %vm1435_vm2, %v5532_v34  ;;  %5436 = vmatmul.msk.bf16.gmra.mxu3 %vm1435_vm2, %v5564_v36 }
 0x13b   :  { %v5951_v42 = vpack.c.bf16 %v4168_v40, %v4167_v38  ;;  %v6111_v43 = vpack.c.bf16 %v4232_v41, %v4231_v39  ;;  %v4041_v59 = vsel %vm3529_vm0, %v3273_v44, %v3785_v51  ;;  %v4105_v60 = vsel %vm3593_vm1, %v3337_v46, %v3849_v52  ;;  %v5470_v44 = vld [vmem:[%s7203_s0 + $0xa8] sm:$0xff] }
 0x13c   :  { %v5502_v46 = vld [vmem:[%s7203_s0 + $0x1a8] sm:$0xff] }
 0x13d   :  { %6291 = vst [vmem:[#allocation3 + $0x250] sm:$0xff] %v5951_v42   ;;  %v2211_v47 = vpop.f32.mrf.mxu2  ;;  %v2371_v48 = vpop.f32.mrf.mxu3  ;;  %v5534_v52 = vld [vmem:[%s7203_s0 + $0x2a8] sm:$0xff] }
 0x13e   :  { %6323 = vst [vmem:[#allocation3 + $0x350] sm:$0xff] %v6111_v43   ;;  %v1893_v49 = vpop.f32.mrf.mxu0  ;;  %v2053_v50 = vpop.f32.mrf.mxu1  ;;  %v3401_v55 = vadd.f32 %v6782_v35, %v2211_v47  ;;  %v3465_v58 = vadd.f32 %v6782_v35, %v2371_v48 }
 0x13f   :  { %v3274_v53 = vadd.f32 %v6782_v35, %v1893_v49  ;;  %v3338_v54 = vadd.f32 %v6782_v35, %v2053_v50 }
 0x140   :  { %v3913_v1 = vmul.f32 0.2, %v3401_v55  ;;  %vm3657_vm5 = vcmp.ge.f32.partialorder %v3401_v55, 0.0  ;;  %v3977_v6 = vmul.f32 0.2, %v3465_v58  ;;  %vm3721_vm6 = vcmp.ge.f32.partialorder %v3465_v58, 0.0 }
 0x141   :  { %vm3530_vm3 = vcmp.ge.f32.partialorder %v3274_v53, 0.0  ;;  %v3786_v56 = vmul.f32 0.2, %v3274_v53  ;;  %vm3594_vm4 = vcmp.ge.f32.partialorder %v3338_v54, 0.0  ;;  %v3850_v57 = vmul.f32 0.2, %v3338_v54 }
 0x142   :  { %v4169_v15 = vsel %vm3657_vm5, %v3401_v55, %v3913_v1  ;;  %v4233_v16 = vsel %vm3721_vm6, %v3465_v58, %v3977_v6 }
 0x143   :  { %v4042_v61 = vsel %vm3530_vm3, %v3274_v53, %v3786_v56  ;;  %v4106_v62 = vsel %vm3594_vm4, %v3338_v54, %v3850_v57  ;;  %v5566_v53 = vld [vmem:[%s7203_s0 + $0x3a8] sm:$0xff] }
 0x144   :  { %v5636_v63 = vpack.c.bf16 %v4042_v61, %v4041_v59  ;;  %v5796_v0 = vpack.c.bf16 %v4106_v62, %v4105_v60 }
 0x145   :  { %v2213_v2 = vpop.f32.mrf.mxu2  ;;  %v2373_v3 = vpop.f32.mrf.mxu3 }
 0x146   :  { %6228 = vst [vmem:[#allocation3 + $0x58] sm:$0xff] %v5636_v63   ;;  %v3402_v7 = vadd.f32 %v6782_v35, %v2213_v2  ;;  %v3466_v8 = vadd.f32 %v6782_v35, %v2373_v3  ;;  %v1896_v9 = vpop.f32.mrf.mxu0  ;;  %v2056_v10 = vpop.f32.mrf.mxu1 }
 0x147   :  { %6260 = vst [vmem:[#allocation3 + $0x158] sm:$0xff] %v5796_v0   ;;  %v3275_v21 = vadd.f32 %v6782_v35, %v1896_v9  ;;  %v3339_v22 = vadd.f32 %v6782_v35, %v2056_v10 }
 0x148   :  { %vm3658_vm7 = vcmp.ge.f32.partialorder %v3402_v7, 0.0  ;;  %v3914_v13 = vmul.f32 0.2, %v3402_v7  ;;  %vm3722_vm8 = vcmp.ge.f32.partialorder %v3466_v8, 0.0  ;;  %v3978_v14 = vmul.f32 0.2, %v3466_v8 }
 0x149   :  { %5341 = vmatmul.msk.bf16.gmra.mxu0 %vm1435_vm2, %v5469_v4  ;;  %5373 = vmatmul.msk.bf16.gmra.mxu1 %vm1435_vm2, %v5501_v5  ;;  %v3787_v27 = vmul.f32 0.2, %v3275_v21  ;;  %v3851_v28 = vmul.f32 0.2, %v3339_v22  ;;  %vm3531_vm9 = vcmp.ge.f32.partialorder %v3275_v21, 0.0  ;;  %vm3595_vm10 = vcmp.ge.f32.partialorder %v3339_v22, 0.0 }
 0x14a   :  { %v4170_v17 = vsel %vm3658_vm7, %v3402_v7, %v3914_v13  ;;  %v4234_v18 = vsel %vm3722_vm8, %v3466_v8, %v3978_v14  ;;  %5405 = vmatmul.msk.bf16.gmra.mxu2 %vm1435_vm2, %v5533_v11  ;;  %5437 = vmatmul.msk.bf16.gmra.mxu3 %vm1435_vm2, %v5565_v12 }
 0x14b   :  { %v5956_v19 = vpack.c.bf16 %v4170_v17, %v4169_v15  ;;  %v6116_v20 = vpack.c.bf16 %v4234_v18, %v4233_v16  ;;  %v4043_v36 = vsel %vm3531_vm9, %v3275_v21, %v3787_v27  ;;  %v4107_v37 = vsel %vm3595_vm10, %v3339_v22, %v3851_v28  ;;  %v5471_v21 = vld [vmem:[%s7203_s0 + $0xb0] sm:$0xff] }
 0x14c   :  { %v5503_v22 = vld [vmem:[%s7203_s0 + $0x1b0] sm:$0xff] }
 0x14d   :  { %6292 = vst [vmem:[#allocation3 + $0x258] sm:$0xff] %v5956_v19   ;;  %v2216_v23 = vpop.f32.mrf.mxu2  ;;  %v2376_v24 = vpop.f32.mrf.mxu3  ;;  %v5535_v28 = vld [vmem:[%s7203_s0 + $0x2b0] sm:$0xff] }
 0x14e   :  { %6324 = vst [vmem:[#allocation3 + $0x358] sm:$0xff] %v6116_v20   ;;  %v1898_v25 = vpop.f32.mrf.mxu0  ;;  %v2058_v26 = vpop.f32.mrf.mxu1  ;;  %v3403_v31 = vadd.f32 %v6782_v35, %v2216_v23  ;;  %v3467_v34 = vadd.f32 %v6782_v35, %v2376_v24 }
 0x14f   :  { %v3276_v29 = vadd.f32 %v6782_v35, %v1898_v25  ;;  %v3340_v30 = vadd.f32 %v6782_v35, %v2058_v26 }
 0x150   :  { %v3915_v41 = vmul.f32 0.2, %v3403_v31  ;;  %vm3659_vm13 = vcmp.ge.f32.partialorder %v3403_v31, 0.0  ;;  %v3979_v47 = vmul.f32 0.2, %v3467_v34  ;;  %vm3723_vm14 = vcmp.ge.f32.partialorder %v3467_v34, 0.0 }
 0x151   :  { %vm3532_vm11 = vcmp.ge.f32.partialorder %v3276_v29, 0.0  ;;  %v3788_v32 = vmul.f32 0.2, %v3276_v29  ;;  %vm3596_vm12 = vcmp.ge.f32.partialorder %v3340_v30, 0.0  ;;  %v3852_v33 = vmul.f32 0.2, %v3340_v30 }
 0x152   :  { %v4171_v56 = vsel %vm3659_vm13, %v3403_v31, %v3915_v41  ;;  %v4235_v57 = vsel %vm3723_vm14, %v3467_v34, %v3979_v47 }
 0x153   :  { %v4044_v45 = vsel %vm3532_vm11, %v3276_v29, %v3788_v32  ;;  %v4108_v38 = vsel %vm3596_vm12, %v3340_v30, %v3852_v33  ;;  %v5567_v29 = vld [vmem:[%s7203_s0 + $0x3b0] sm:$0xff] }
 0x154   :  { %v5641_v39 = vpack.c.bf16 %v4044_v45, %v4043_v36  ;;  %v5801_v40 = vpack.c.bf16 %v4108_v38, %v4107_v37 }
 0x155   :  { %v2218_v42 = vpop.f32.mrf.mxu2  ;;  %v2378_v43 = vpop.f32.mrf.mxu3 }
 0x156   :  { %6229 = vst [vmem:[#allocation3 + $0x60] sm:$0xff] %v5641_v39   ;;  %v3404_v48 = vadd.f32 %v6782_v35, %v2218_v42  ;;  %v3468_v49 = vadd.f32 %v6782_v35, %v2378_v43  ;;  %v1901_v50 = vpop.f32.mrf.mxu0  ;;  %v2061_v51 = vpop.f32.mrf.mxu1 }
 0x157   :  { %6261 = vst [vmem:[#allocation3 + $0x160] sm:$0xff] %v5801_v40   ;;  %v3277_v62 = vadd.f32 %v6782_v35, %v1901_v50  ;;  %v3341_v63 = vadd.f32 %v6782_v35, %v2061_v51 }
 0x158   :  { %vm3660_vm15 = vcmp.ge.f32.partialorder %v3404_v48, 0.0  ;;  %v3916_v54 = vmul.f32 0.2, %v3404_v48  ;;  %vm3724_vm0 = vcmp.ge.f32.partialorder %v3468_v49, 0.0  ;;  %v3980_v55 = vmul.f32 0.2, %v3468_v49 }
 0x159   :  { %5342 = vmatmul.msk.bf16.gmra.mxu0 %vm1435_vm2, %v5470_v44  ;;  %5374 = vmatmul.msk.bf16.gmra.mxu1 %vm1435_vm2, %v5502_v46  ;;  %v3789_v4 = vmul.f32 0.2, %v3277_v62  ;;  %v3853_v5 = vmul.f32 0.2, %v3341_v63  ;;  %vm3533_vm1 = vcmp.ge.f32.partialorder %v3277_v62, 0.0  ;;  %vm3597_vm3 = vcmp.ge.f32.partialorder %v3341_v63, 0.0 }
 0x15a   :  { %v4172_v58 = vsel %vm3660_vm15, %v3404_v48, %v3916_v54  ;;  %v4236_v59 = vsel %vm3724_vm0, %v3468_v49, %v3980_v55  ;;  %5406 = vmatmul.msk.bf16.gmra.mxu2 %vm1435_vm2, %v5534_v52  ;;  %5438 = vmatmul.msk.bf16.gmra.mxu3 %vm1435_vm2, %v5566_v53 }
 0x15b   :  { %v5961_v60 = vpack.c.bf16 %v4172_v58, %v4171_v56  ;;  %v6121_v61 = vpack.c.bf16 %v4236_v59, %v4235_v57  ;;  %v4045_v12 = vsel %vm3533_vm1, %v3277_v62, %v3789_v4  ;;  %v4109_v13 = vsel %vm3597_vm3, %v3341_v63, %v3853_v5  ;;  %v5472_v62 = vld [vmem:[%s7203_s0 + $0xb8] sm:$0xff] }
 0x15c   :  { %v5504_v63 = vld [vmem:[%s7203_s0 + $0x1b8] sm:$0xff] }
 0x15d   :  { %6293 = vst [vmem:[#allocation3 + $0x260] sm:$0xff] %v5961_v60   ;;  %v2221_v0 = vpop.f32.mrf.mxu2  ;;  %v2381_v1 = vpop.f32.mrf.mxu3  ;;  %v5536_v5 = vld [vmem:[%s7203_s0 + $0x2b8] sm:$0xff] }
 0x15e   :  { %6325 = vst [vmem:[#allocation3 + $0x360] sm:$0xff] %v6121_v61   ;;  %v1903_v2 = vpop.f32.mrf.mxu0  ;;  %v2063_v3 = vpop.f32.mrf.mxu1  ;;  %v3405_v8 = vadd.f32 %v6782_v35, %v2221_v0  ;;  %v3469_v11 = vadd.f32 %v6782_v35, %v2381_v1 }
 0x15f   :  { %v3278_v6 = vadd.f32 %v6782_v35, %v1903_v2  ;;  %v3342_v7 = vadd.f32 %v6782_v35, %v2063_v3 }
 0x160   :  { %v3917_v18 = vmul.f32 0.2, %v3405_v8  ;;  %vm3661_vm6 = vcmp.ge.f32.partialorder %v3405_v8, 0.0  ;;  %v3981_v23 = vmul.f32 0.2, %v3469_v11  ;;  %vm3725_vm7 = vcmp.ge.f32.partialorder %v3469_v11, 0.0 }
 0x161   :  { %vm3534_vm4 = vcmp.ge.f32.partialorder %v3278_v6, 0.0  ;;  %v3790_v9 = vmul.f32 0.2, %v3278_v6  ;;  %vm3598_vm5 = vcmp.ge.f32.partialorder %v3342_v7, 0.0  ;;  %v3854_v10 = vmul.f32 0.2, %v3342_v7 }
 0x162   :  { %v4173_v32 = vsel %vm3661_vm6, %v3405_v8, %v3917_v18  ;;  %v4237_v33 = vsel %vm3725_vm7, %v3469_v11, %v3981_v23 }
 0x163   :  { %v4046_v14 = vsel %vm3534_vm4, %v3278_v6, %v3790_v9  ;;  %v4110_v15 = vsel %vm3598_vm5, %v3342_v7, %v3854_v10  ;;  %v5568_v6 = vld [vmem:[%s7203_s0 + $0x3b8] sm:$0xff] }
 0x164   :  { %v5646_v16 = vpack.c.bf16 %v4046_v14, %v4045_v12  ;;  %v5806_v17 = vpack.c.bf16 %v4110_v15, %v4109_v13 }
 0x165   :  { %v2223_v19 = vpop.f32.mrf.mxu2  ;;  %v2383_v20 = vpop.f32.mrf.mxu3 }
 0x166   :  { %6230 = vst [vmem:[#allocation3 + $0x68] sm:$0xff] %v5646_v16   ;;  %v3406_v24 = vadd.f32 %v6782_v35, %v2223_v19  ;;  %v3470_v25 = vadd.f32 %v6782_v35, %v2383_v20  ;;  %v1906_v26 = vpop.f32.mrf.mxu0  ;;  %v2066_v27 = vpop.f32.mrf.mxu1 }
 0x167   :  { %6262 = vst [vmem:[#allocation3 + $0x168] sm:$0xff] %v5806_v17   ;;  %v3279_v38 = vadd.f32 %v6782_v35, %v1906_v26  ;;  %v3343_v39 = vadd.f32 %v6782_v35, %v2066_v27 }
 0x168   :  { %vm3662_vm8 = vcmp.ge.f32.partialorder %v3406_v24, 0.0  ;;  %v3918_v30 = vmul.f32 0.2, %v3406_v24  ;;  %vm3726_vm9 = vcmp.ge.f32.partialorder %v3470_v25, 0.0  ;;  %v3982_v31 = vmul.f32 0.2, %v3470_v25 }
 0x169   :  { %5343 = vmatmul.msk.bf16.gmra.mxu0 %vm1435_vm2, %v5471_v21  ;;  %5375 = vmatmul.msk.bf16.gmra.mxu1 %vm1435_vm2, %v5503_v22  ;;  %v3791_v44 = vmul.f32 0.2, %v3279_v38  ;;  %v3855_v46 = vmul.f32 0.2, %v3343_v39  ;;  %vm3535_vm10 = vcmp.ge.f32.partialorder %v3279_v38, 0.0  ;;  %vm3599_vm11 = vcmp.ge.f32.partialorder %v3343_v39, 0.0 }
 0x16a   :  { %v4174_v34 = vsel %vm3662_vm8, %v3406_v24, %v3918_v30  ;;  %v4238_v36 = vsel %vm3726_vm9, %v3470_v25, %v3982_v31  ;;  %5407 = vmatmul.msk.bf16.gmra.mxu2 %vm1435_vm2, %v5535_v28  ;;  %5439 = vmatmul.msk.bf16.gmra.mxu3 %vm1435_vm2, %v5567_v29 }
 0x16b   :  { %v5966_v37 = vpack.c.bf16 %v4174_v34, %v4173_v32  ;;  %v6126_v45 = vpack.c.bf16 %v4238_v36, %v4237_v33  ;;  %v4047_v53 = vsel %vm3535_vm10, %v3279_v38, %v3791_v44  ;;  %v4111_v54 = vsel %vm3599_vm11, %v3343_v39, %v3855_v46  ;;  %v5473_v38 = vld [vmem:[%s7203_s0 + $0xc0] sm:$0xff] }
 0x16c   :  { %v5505_v39 = vld [vmem:[%s7203_s0 + $0x1c0] sm:$0xff] }
 0x16d   :  { %6294 = vst [vmem:[#allocation3 + $0x268] sm:$0xff] %v5966_v37   ;;  %v2226_v40 = vpop.f32.mrf.mxu2  ;;  %v2386_v41 = vpop.f32.mrf.mxu3  ;;  %v5537_v46 = vld [vmem:[%s7203_s0 + $0x2c0] sm:$0xff] }
 0x16e   :  { %6326 = vst [vmem:[#allocation3 + $0x368] sm:$0xff] %v6126_v45   ;;  %v1908_v42 = vpop.f32.mrf.mxu0  ;;  %v2068_v43 = vpop.f32.mrf.mxu1  ;;  %v3407_v49 = vadd.f32 %v6782_v35, %v2226_v40  ;;  %v3471_v52 = vadd.f32 %v6782_v35, %v2386_v41 }
 0x16f   :  { %v3280_v47 = vadd.f32 %v6782_v35, %v1908_v42  ;;  %v3344_v48 = vadd.f32 %v6782_v35, %v2068_v43 }
 0x170   :  { %v3919_v59 = vmul.f32 0.2, %v3407_v49  ;;  %vm3663_vm14 = vcmp.ge.f32.partialorder %v3407_v49, 0.0  ;;  %v3983_v0 = vmul.f32 0.2, %v3471_v52  ;;  %vm3727_vm15 = vcmp.ge.f32.partialorder %v3471_v52, 0.0 }
 0x171   :  { %vm3536_vm12 = vcmp.ge.f32.partialorder %v3280_v47, 0.0  ;;  %v3792_v50 = vmul.f32 0.2, %v3280_v47  ;;  %vm3600_vm13 = vcmp.ge.f32.partialorder %v3344_v48, 0.0  ;;  %v3856_v51 = vmul.f32 0.2, %v3344_v48 }
 0x172   :  { %v4175_v9 = vsel %vm3663_vm14, %v3407_v49, %v3919_v59  ;;  %v4239_v10 = vsel %vm3727_vm15, %v3471_v52, %v3983_v0 }
 0x173   :  { %v4048_v55 = vsel %vm3536_vm12, %v3280_v47, %v3792_v50  ;;  %v4112_v56 = vsel %vm3600_vm13, %v3344_v48, %v3856_v51  ;;  %v5569_v47 = vld [vmem:[%s7203_s0 + $0x3c0] sm:$0xff] }
 0x174   :  { %v5651_v57 = vpack.c.bf16 %v4048_v55, %v4047_v53  ;;  %v5811_v58 = vpack.c.bf16 %v4112_v56, %v4111_v54 }
 0x175   :  { %v2228_v60 = vpop.f32.mrf.mxu2  ;;  %v2388_v61 = vpop.f32.mrf.mxu3 }
 0x176   :  { %6231 = vst [vmem:[#allocation3 + $0x70] sm:$0xff] %v5651_v57   ;;  %v3408_v1 = vadd.f32 %v6782_v35, %v2228_v60  ;;  %v3472_v2 = vadd.f32 %v6782_v35, %v2388_v61  ;;  %v1911_v3 = vpop.f32.mrf.mxu0  ;;  %v2071_v4 = vpop.f32.mrf.mxu1 }
 0x177   :  { %6263 = vst [vmem:[#allocation3 + $0x170] sm:$0xff] %v5811_v58   ;;  %v3281_v15 = vadd.f32 %v6782_v35, %v1911_v3  ;;  %v3345_v16 = vadd.f32 %v6782_v35, %v2071_v4 }
 0x178   :  { %vm3664_vm0 = vcmp.ge.f32.partialorder %v3408_v1, 0.0  ;;  %v3920_v7 = vmul.f32 0.2, %v3408_v1  ;;  %vm3728_vm1 = vcmp.ge.f32.partialorder %v3472_v2, 0.0  ;;  %v3984_v8 = vmul.f32 0.2, %v3472_v2 }
 0x179   :  { %5344 = vmatmul.msk.bf16.gmra.mxu0 %vm1435_vm2, %v5472_v62  ;;  %5376 = vmatmul.msk.bf16.gmra.mxu1 %vm1435_vm2, %v5504_v63  ;;  %v3793_v21 = vmul.f32 0.2, %v3281_v15  ;;  %v3857_v22 = vmul.f32 0.2, %v3345_v16  ;;  %vm3537_vm3 = vcmp.ge.f32.partialorder %v3281_v15, 0.0  ;;  %vm3601_vm4 = vcmp.ge.f32.partialorder %v3345_v16, 0.0 }
 0x17a   :  { %v4176_v11 = vsel %vm3664_vm0, %v3408_v1, %v3920_v7  ;;  %v4240_v12 = vsel %vm3728_vm1, %v3472_v2, %v3984_v8  ;;  %5408 = vmatmul.msk.bf16.gmra.mxu2 %vm1435_vm2, %v5536_v5  ;;  %5440 = vmatmul.msk.bf16.gmra.mxu3 %vm1435_vm2, %v5568_v6 }
 0x17b   :  { %v5971_v13 = vpack.c.bf16 %v4176_v11, %v4175_v9  ;;  %v6131_v14 = vpack.c.bf16 %v4240_v12, %v4239_v10  ;;  %v4049_v29 = vsel %vm3537_vm3, %v3281_v15, %v3793_v21  ;;  %v4113_v30 = vsel %vm3601_vm4, %v3345_v16, %v3857_v22  ;;  %v5474_v15 = vld [vmem:[%s7203_s0 + $0xc8] sm:$0xff] }
 0x17c   :  { %v5506_v16 = vld [vmem:[%s7203_s0 + $0x1c8] sm:$0xff] }
 0x17d   :  { %6295 = vst [vmem:[#allocation3 + $0x270] sm:$0xff] %v5971_v13   ;;  %v2231_v17 = vpop.f32.mrf.mxu2  ;;  %v2391_v18 = vpop.f32.mrf.mxu3  ;;  %v5538_v22 = vld [vmem:[%s7203_s0 + $0x2c8] sm:$0xff] }
 0x17e   :  { %6327 = vst [vmem:[#allocation3 + $0x370] sm:$0xff] %v6131_v14   ;;  %v1913_v19 = vpop.f32.mrf.mxu0  ;;  %v2073_v20 = vpop.f32.mrf.mxu1  ;;  %v3409_v25 = vadd.f32 %v6782_v35, %v2231_v17  ;;  %v3473_v28 = vadd.f32 %v6782_v35, %v2391_v18 }
 0x17f   :  { %v3282_v23 = vadd.f32 %v6782_v35, %v1913_v19  ;;  %v3346_v24 = vadd.f32 %v6782_v35, %v2073_v20 }
 0x180   :  { %v3921_v36 = vmul.f32 0.2, %v3409_v25  ;;  %vm3665_vm7 = vcmp.ge.f32.partialorder %v3409_v25, 0.0  ;;  %v3985_v40 = vmul.f32 0.2, %v3473_v28  ;;  %vm3729_vm8 = vcmp.ge.f32.partialorder %v3473_v28, 0.0 }
 0x181   :  { %vm3538_vm5 = vcmp.ge.f32.partialorder %v3282_v23, 0.0  ;;  %v3794_v26 = vmul.f32 0.2, %v3282_v23  ;;  %vm3602_vm6 = vcmp.ge.f32.partialorder %v3346_v24, 0.0  ;;  %v3858_v27 = vmul.f32 0.2, %v3346_v24 }
 0x182   :  { %v4177_v50 = vsel %vm3665_vm7, %v3409_v25, %v3921_v36  ;;  %v4241_v51 = vsel %vm3729_vm8, %v3473_v28, %v3985_v40 }
 0x183   :  { %v4050_v31 = vsel %vm3538_vm5, %v3282_v23, %v3794_v26  ;;  %v4114_v32 = vsel %vm3602_vm6, %v3346_v24, %v3858_v27  ;;  %v5570_v23 = vld [vmem:[%s7203_s0 + $0x3c8] sm:$0xff] }
 0x184   :  { %v5656_v33 = vpack.c.bf16 %v4050_v31, %v4049_v29  ;;  %v5816_v34 = vpack.c.bf16 %v4114_v32, %v4113_v30 }
 0x185   :  { %v2233_v37 = vpop.f32.mrf.mxu2  ;;  %v2393_v45 = vpop.f32.mrf.mxu3 }
 0x186   :  { %6232 = vst [vmem:[#allocation3 + $0x78] sm:$0xff] %v5656_v33   ;;  %v3410_v41 = vadd.f32 %v6782_v35, %v2233_v37  ;;  %v3474_v42 = vadd.f32 %v6782_v35, %v2393_v45  ;;  %v1916_v43 = vpop.f32.mrf.mxu0  ;;  %v2076_v44 = vpop.f32.mrf.mxu1 }
 0x187   :  { %6264 = vst [vmem:[#allocation3 + $0x178] sm:$0xff] %v5816_v34   ;;  %v3283_v56 = vadd.f32 %v6782_v35, %v1916_v43  ;;  %v3347_v57 = vadd.f32 %v6782_v35, %v2076_v44 }
 0x188   :  { %vm3666_vm9 = vcmp.ge.f32.partialorder %v3410_v41, 0.0  ;;  %v3922_v48 = vmul.f32 0.2, %v3410_v41  ;;  %vm3730_vm10 = vcmp.ge.f32.partialorder %v3474_v42, 0.0  ;;  %v3986_v49 = vmul.f32 0.2, %v3474_v42 }
 0x189   :  { %5345 = vmatmul.msk.bf16.gmra.mxu0 %vm1435_vm2, %v5473_v38  ;;  %5377 = vmatmul.msk.bf16.gmra.mxu1 %vm1435_vm2, %v5505_v39  ;;  %v3795_v62 = vmul.f32 0.2, %v3283_v56  ;;  %v3859_v63 = vmul.f32 0.2, %v3347_v57  ;;  %vm3539_vm11 = vcmp.ge.f32.partialorder %v3283_v56, 0.0  ;;  %vm3603_vm12 = vcmp.ge.f32.partialorder %v3347_v57, 0.0 }
 0x18a   :  { %v4178_v52 = vsel %vm3666_vm9, %v3410_v41, %v3922_v48  ;;  %v4242_v53 = vsel %vm3730_vm10, %v3474_v42, %v3986_v49  ;;  %5409 = vmatmul.msk.bf16.gmra.mxu2 %vm1435_vm2, %v5537_v46  ;;  %5441 = vmatmul.msk.bf16.gmra.mxu3 %vm1435_vm2, %v5569_v47 }
 0x18b   :  { %v5976_v54 = vpack.c.bf16 %v4178_v52, %v4177_v50  ;;  %v6136_v55 = vpack.c.bf16 %v4242_v53, %v4241_v51  ;;  %v4051_v6 = vsel %vm3539_vm11, %v3283_v56, %v3795_v62  ;;  %v4115_v7 = vsel %vm3603_vm12, %v3347_v57, %v3859_v63  ;;  %v5475_v56 = vld [vmem:[%s7203_s0 + $0xd0] sm:$0xff] }
 0x18c   :  { %v5507_v57 = vld [vmem:[%s7203_s0 + $0x1d0] sm:$0xff] }
 0x18d   :  { %6296 = vst [vmem:[#allocation3 + $0x278] sm:$0xff] %v5976_v54   ;;  %v2236_v58 = vpop.f32.mrf.mxu2  ;;  %v2396_v59 = vpop.f32.mrf.mxu3  ;;  %v5539_v63 = vld [vmem:[%s7203_s0 + $0x2d0] sm:$0xff] }
 0x18e   :  { %6328 = vst [vmem:[#allocation3 + $0x378] sm:$0xff] %v6136_v55   ;;  %v1918_v60 = vpop.f32.mrf.mxu0  ;;  %v2078_v61 = vpop.f32.mrf.mxu1  ;;  %v3411_v2 = vadd.f32 %v6782_v35, %v2236_v58  ;;  %v3475_v5 = vadd.f32 %v6782_v35, %v2396_v59 }
 0x18f   :  { %v3284_v0 = vadd.f32 %v6782_v35, %v1918_v60  ;;  %v3348_v1 = vadd.f32 %v6782_v35, %v2078_v61 }
 0x190   :  { %v3923_v12 = vmul.f32 0.2, %v3411_v2  ;;  %vm3667_vm15 = vcmp.ge.f32.partialorder %v3411_v2, 0.0  ;;  %v3987_v17 = vmul.f32 0.2, %v3475_v5  ;;  %vm3731_vm0 = vcmp.ge.f32.partialorder %v3475_v5, 0.0 }
 0x191   :  { %vm3540_vm13 = vcmp.ge.f32.partialorder %v3284_v0, 0.0  ;;  %v3796_v3 = vmul.f32 0.2, %v3284_v0  ;;  %vm3604_vm14 = vcmp.ge.f32.partialorder %v3348_v1, 0.0  ;;  %v3860_v4 = vmul.f32 0.2, %v3348_v1 }
 0x192   :  { %v4179_v26 = vsel %vm3667_vm15, %v3411_v2, %v3923_v12  ;;  %v4243_v27 = vsel %vm3731_vm0, %v3475_v5, %v3987_v17 }
 0x193   :  { %v4052_v8 = vsel %vm3540_vm13, %v3284_v0, %v3796_v3  ;;  %v4116_v9 = vsel %vm3604_vm14, %v3348_v1, %v3860_v4  ;;  %v5571_v0 = vld [vmem:[%s7203_s0 + $0x3d0] sm:$0xff] }
 0x194   :  { %v5661_v10 = vpack.c.bf16 %v4052_v8, %v4051_v6  ;;  %v5821_v11 = vpack.c.bf16 %v4116_v9, %v4115_v7 }
 0x195   :  { %v2238_v13 = vpop.f32.mrf.mxu2  ;;  %v2398_v14 = vpop.f32.mrf.mxu3 }
 0x196   :  { %6233 = vst [vmem:[#allocation3 + $0x80] sm:$0xff] %v5661_v10   ;;  %v3412_v18 = vadd.f32 %v6782_v35, %v2238_v13  ;;  %v3476_v19 = vadd.f32 %v6782_v35, %v2398_v14  ;;  %v1921_v20 = vpop.f32.mrf.mxu0  ;;  %v2081_v21 = vpop.f32.mrf.mxu1 }
 0x197   :  { %6265 = vst [vmem:[#allocation3 + $0x180] sm:$0xff] %v5821_v11   ;;  %v3285_v32 = vadd.f32 %v6782_v35, %v1921_v20  ;;  %v3349_v33 = vadd.f32 %v6782_v35, %v2081_v21 }
 0x198   :  { %vm3668_vm1 = vcmp.ge.f32.partialorder %v3412_v18, 0.0  ;;  %v3924_v24 = vmul.f32 0.2, %v3412_v18  ;;  %vm3732_vm3 = vcmp.ge.f32.partialorder %v3476_v19, 0.0  ;;  %v3988_v25 = vmul.f32 0.2, %v3476_v19 }
 0x199   :  { %5346 = vmatmul.msk.bf16.gmra.mxu0 %vm1435_vm2, %v5474_v15  ;;  %5378 = vmatmul.msk.bf16.gmra.mxu1 %vm1435_vm2, %v5506_v16  ;;  %v3797_v38 = vmul.f32 0.2, %v3285_v32  ;;  %v3861_v39 = vmul.f32 0.2, %v3349_v33  ;;  %vm3541_vm4 = vcmp.ge.f32.partialorder %v3285_v32, 0.0  ;;  %vm3605_vm5 = vcmp.ge.f32.partialorder %v3349_v33, 0.0 }
 0x19a   :  { %v4180_v28 = vsel %vm3668_vm1, %v3412_v18, %v3924_v24  ;;  %v4244_v29 = vsel %vm3732_vm3, %v3476_v19, %v3988_v25  ;;  %5410 = vmatmul.msk.bf16.gmra.mxu2 %vm1435_vm2, %v5538_v22  ;;  %5442 = vmatmul.msk.bf16.gmra.mxu3 %vm1435_vm2, %v5570_v23  ;;  %v7006_v22 = vld [vmem:[%s7205_s2] ss:$0 sm:$0xff] }
 0x19b   :  { %v5981_v30 = vpack.c.bf16 %v4180_v28, %v4179_v26  ;;  %v6141_v31 = vpack.c.bf16 %v4244_v29, %v4243_v27  ;;  %v4053_v47 = vsel %vm3541_vm4, %v3285_v32, %v3797_v38  ;;  %v4117_v48 = vsel %vm3605_vm5, %v3349_v33, %v3861_v39  ;;  %v5476_v32 = vld [vmem:[%s7203_s0 + $0xd8] sm:$0xff] }
 0x19c   :  { %v5508_v33 = vld [vmem:[%s7203_s0 + $0x1d8] sm:$0xff] }
 0x19d   :  { %6297 = vst [vmem:[#allocation3 + $0x280] sm:$0xff] %v5981_v30   ;;  %v2241_v34 = vpop.f32.mrf.mxu2  ;;  %v2401_v36 = vpop.f32.mrf.mxu3  ;;  %v5540_v39 = vld [vmem:[%s7203_s0 + $0x2d8] sm:$0xff] }
 0x19e   :  { %6329 = vst [vmem:[#allocation3 + $0x380] sm:$0xff] %v6141_v31   ;;  %v1923_v37 = vpop.f32.mrf.mxu0  ;;  %v2083_v45 = vpop.f32.mrf.mxu1  ;;  %v3413_v42 = vadd.f32 %v6782_v35, %v2241_v34  ;;  %v3477_v46 = vadd.f32 %v6782_v35, %v2401_v36 }
 0x19f   :  { %v3286_v40 = vadd.f32 %v6782_v35, %v1923_v37  ;;  %v3350_v41 = vadd.f32 %v6782_v35, %v2083_v45 }
 0x1a0   :  { %v3925_v53 = vmul.f32 0.2, %v3413_v42  ;;  %vm3669_vm8 = vcmp.ge.f32.partialorder %v3413_v42, 0.0  ;;  %v3989_v58 = vmul.f32 0.2, %v3477_v46  ;;  %vm3733_vm9 = vcmp.ge.f32.partialorder %v3477_v46, 0.0 }
 0x1a1   :  { %vm3542_vm6 = vcmp.ge.f32.partialorder %v3286_v40, 0.0  ;;  %v3798_v43 = vmul.f32 0.2, %v3286_v40  ;;  %vm3606_vm7 = vcmp.ge.f32.partialorder %v3350_v41, 0.0  ;;  %v3862_v44 = vmul.f32 0.2, %v3350_v41 }
 0x1a2   :  { %v4181_v3 = vsel %vm3669_vm8, %v3413_v42, %v3925_v53  ;;  %v4245_v4 = vsel %vm3733_vm9, %v3477_v46, %v3989_v58 }
 0x1a3   :  { %v4054_v49 = vsel %vm3542_vm6, %v3286_v40, %v3798_v43  ;;  %v4118_v50 = vsel %vm3606_vm7, %v3350_v41, %v3862_v44  ;;  %v5572_v40 = vld [vmem:[%s7203_s0 + $0x3d8] sm:$0xff] }
 0x1a4   :  { %v5666_v51 = vpack.c.bf16 %v4054_v49, %v4053_v47  ;;  %v5826_v52 = vpack.c.bf16 %v4118_v50, %v4117_v48 }
 0x1a5   :  { %v2243_v54 = vpop.f32.mrf.mxu2  ;;  %v2403_v55 = vpop.f32.mrf.mxu3 }
 0x1a6   :  { %6234 = vst [vmem:[#allocation3 + $0x88] sm:$0xff] %v5666_v51   ;;  %v3414_v59 = vadd.f32 %v6782_v35, %v2243_v54  ;;  %v3478_v60 = vadd.f32 %v6782_v35, %v2403_v55  ;;  %v1926_v61 = vpop.f32.mrf.mxu0  ;;  %v2086_v62 = vpop.f32.mrf.mxu1 }
 0x1a7   :  { %6266 = vst [vmem:[#allocation3 + $0x188] sm:$0xff] %v5826_v52   ;;  %v3287_v9 = vadd.f32 %v6782_v35, %v1926_v61  ;;  %v3351_v10 = vadd.f32 %v6782_v35, %v2086_v62 }
 0x1a8   :  { %vm3670_vm10 = vcmp.ge.f32.partialorder %v3414_v59, 0.0  ;;  %v3926_v1 = vmul.f32 0.2, %v3414_v59  ;;  %vm3734_vm11 = vcmp.ge.f32.partialorder %v3478_v60, 0.0  ;;  %v3990_v2 = vmul.f32 0.2, %v3478_v60 }
 0x1a9   :  { %5347 = vmatmul.msk.bf16.gmra.mxu0 %vm1435_vm2, %v5475_v56  ;;  %5379 = vmatmul.msk.bf16.gmra.mxu1 %vm1435_vm2, %v5507_v57  ;;  %v3799_v15 = vmul.f32 0.2, %v3287_v9  ;;  %v3863_v16 = vmul.f32 0.2, %v3351_v10  ;;  %vm3543_vm12 = vcmp.ge.f32.partialorder %v3287_v9, 0.0  ;;  %vm3607_vm13 = vcmp.ge.f32.partialorder %v3351_v10, 0.0 }
 0x1aa   :  { %v4182_v5 = vsel %vm3670_vm10, %v3414_v59, %v3926_v1  ;;  %v4246_v6 = vsel %vm3734_vm11, %v3478_v60, %v3990_v2  ;;  %5411 = vmatmul.msk.bf16.gmra.mxu2 %vm1435_vm2, %v5539_v63  ;;  %5443 = vmatmul.msk.bf16.gmra.mxu3 %vm1435_vm2, %v5571_v0 }
 0x1ab   :  { %v5986_v7 = vpack.c.bf16 %v4182_v5, %v4181_v3  ;;  %v6146_v8 = vpack.c.bf16 %v4246_v6, %v4245_v4  ;;  %v4055_v24 = vsel %vm3543_vm12, %v3287_v9, %v3799_v15  ;;  %v4119_v25 = vsel %vm3607_vm13, %v3351_v10, %v3863_v16  ;;  %v5477_v9 = vld [vmem:[%s7203_s0 + $0xe0] sm:$0xff] }
 0x1ac   :  { %v5509_v10 = vld [vmem:[%s7203_s0 + $0x1e0] sm:$0xff] }
 0x1ad   :  { %6298 = vst [vmem:[#allocation3 + $0x288] sm:$0xff] %v5986_v7   ;;  %v2246_v11 = vpop.f32.mrf.mxu2  ;;  %v2406_v12 = vpop.f32.mrf.mxu3  ;;  %v5541_v16 = vld [vmem:[%s7203_s0 + $0x2e0] sm:$0xff] }
 0x1ae   :  { %6330 = vst [vmem:[#allocation3 + $0x388] sm:$0xff] %v6146_v8   ;;  %v1928_v13 = vpop.f32.mrf.mxu0  ;;  %v2088_v14 = vpop.f32.mrf.mxu1  ;;  %v3415_v19 = vadd.f32 %v6782_v35, %v2246_v11  ;;  %v3479_v23 = vadd.f32 %v7006_v22, %v2406_v12 }
 0x1af   :  { %v3288_v17 = vadd.f32 %v6782_v35, %v1928_v13  ;;  %v3352_v18 = vadd.f32 %v6782_v35, %v2088_v14 }
 0x1b0   :  { %v3927_v30 = vmul.f32 0.2, %v3415_v19  ;;  %vm3671_vm0 = vcmp.ge.f32.partialorder %v3415_v19, 0.0  ;;  %v3991_v34 = vmul.f32 0.2, %v3479_v23  ;;  %vm3735_vm1 = vcmp.ge.f32.partialorder %v3479_v23, 0.0 }
 0x1b1   :  { %vm3544_vm14 = vcmp.ge.f32.partialorder %v3288_v17, 0.0  ;;  %v3800_v20 = vmul.f32 0.2, %v3288_v17  ;;  %vm3608_vm15 = vcmp.ge.f32.partialorder %v3352_v18, 0.0  ;;  %v3864_v21 = vmul.f32 0.2, %v3352_v18 }
 0x1b2   :  { %v4183_v43 = vsel %vm3671_vm0, %v3415_v19, %v3927_v30  ;;  %v4247_v44 = vsel %vm3735_vm1, %v3479_v23, %v3991_v34 }
 0x1b3   :  { %v4056_v26 = vsel %vm3544_vm14, %v3288_v17, %v3800_v20  ;;  %v4120_v27 = vsel %vm3608_vm15, %v3352_v18, %v3864_v21  ;;  %v5573_v17 = vld [vmem:[%s7203_s0 + $0x3e0] sm:$0xff] }
 0x1b4   :  { %v5671_v28 = vpack.c.bf16 %v4056_v26, %v4055_v24  ;;  %v5831_v29 = vpack.c.bf16 %v4120_v27, %v4119_v25 }
 0x1b5   :  { %v2248_v31 = vpop.f32.mrf.mxu2  ;;  %v2408_v35 = vpop.f32.mrf.mxu3 }
 0x1b6   :  { %6235 = vst [vmem:[#allocation3 + $0x90] sm:$0xff] %v5671_v28   ;;  %v3416_v36 = vadd.f32 %v7006_v22, %v2248_v31  ;;  %v3480_v37 = vadd.f32 %v7006_v22, %v2408_v35  ;;  %v1931_v45 = vpop.f32.mrf.mxu0  ;;  %v2091_v38 = vpop.f32.mrf.mxu1 }
 0x1b7   :  { %6267 = vst [vmem:[#allocation3 + $0x190] sm:$0xff] %v5831_v29   ;;  %v3289_v50 = vadd.f32 %v7006_v22, %v1931_v45  ;;  %v3353_v51 = vadd.f32 %v7006_v22, %v2091_v38 }
 0x1b8   :  { %vm3672_vm3 = vcmp.ge.f32.partialorder %v3416_v36, 0.0  ;;  %v3928_v41 = vmul.f32 0.2, %v3416_v36  ;;  %vm3736_vm4 = vcmp.ge.f32.partialorder %v3480_v37, 0.0  ;;  %v3992_v42 = vmul.f32 0.2, %v3480_v37 }
 0x1b9   :  { %5348 = vmatmul.msk.bf16.gmra.mxu0 %vm1435_vm2, %v5476_v32  ;;  %5380 = vmatmul.msk.bf16.gmra.mxu1 %vm1435_vm2, %v5508_v33  ;;  %v3801_v56 = vmul.f32 0.2, %v3289_v50  ;;  %v3865_v57 = vmul.f32 0.2, %v3353_v51  ;;  %vm3545_vm5 = vcmp.ge.f32.partialorder %v3289_v50, 0.0  ;;  %vm3609_vm6 = vcmp.ge.f32.partialorder %v3353_v51, 0.0 }
 0x1ba   :  { %v4184_v46 = vsel %vm3672_vm3, %v3416_v36, %v3928_v41  ;;  %v4248_v47 = vsel %vm3736_vm4, %v3480_v37, %v3992_v42  ;;  %5412 = vmatmul.msk.bf16.gmra.mxu2 %vm1435_vm2, %v5540_v39  ;;  %5444 = vmatmul.msk.bf16.gmra.mxu3 %vm1435_vm2, %v5572_v40 }
 0x1bb   :  { %v5991_v48 = vpack.c.bf16 %v4184_v46, %v4183_v43  ;;  %v6151_v49 = vpack.c.bf16 %v4248_v47, %v4247_v44  ;;  %v4057_v0 = vsel %vm3545_vm5, %v3289_v50, %v3801_v56  ;;  %v4121_v1 = vsel %vm3609_vm6, %v3353_v51, %v3865_v57  ;;  %v5478_v50 = vld [vmem:[%s7203_s0 + $0xe8] sm:$0xff] }
 0x1bc   :  { %v5510_v51 = vld [vmem:[%s7203_s0 + $0x1e8] sm:$0xff] }
 0x1bd   :  { %6299 = vst [vmem:[#allocation3 + $0x290] sm:$0xff] %v5991_v48   ;;  %v2251_v52 = vpop.f32.mrf.mxu2  ;;  %v2411_v53 = vpop.f32.mrf.mxu3  ;;  %v5542_v57 = vld [vmem:[%s7203_s0 + $0x2e8] sm:$0xff] }
 0x1be   :  { %6331 = vst [vmem:[#allocation3 + $0x390] sm:$0xff] %v6151_v49   ;;  %v1933_v54 = vpop.f32.mrf.mxu0  ;;  %v2093_v55 = vpop.f32.mrf.mxu1  ;;  %v3417_v60 = vadd.f32 %v7006_v22, %v2251_v52  ;;  %v3481_v63 = vadd.f32 %v7006_v22, %v2411_v53 }
 0x1bf   :  { %v3290_v58 = vadd.f32 %v7006_v22, %v1933_v54  ;;  %v3354_v59 = vadd.f32 %v7006_v22, %v2093_v55 }
 0x1c0   :  { %v3929_v6 = vmul.f32 0.2, %v3417_v60  ;;  %vm3673_vm9 = vcmp.ge.f32.partialorder %v3417_v60, 0.0  ;;  %v3993_v11 = vmul.f32 0.2, %v3481_v63  ;;  %vm3737_vm10 = vcmp.ge.f32.partialorder %v3481_v63, 0.0 }
 0x1c1   :  { %vm3546_vm7 = vcmp.ge.f32.partialorder %v3290_v58, 0.0  ;;  %v3802_v61 = vmul.f32 0.2, %v3290_v58  ;;  %vm3610_vm8 = vcmp.ge.f32.partialorder %v3354_v59, 0.0  ;;  %v3866_v62 = vmul.f32 0.2, %v3354_v59 }
 0x1c2   :  { %v4185_v20 = vsel %vm3673_vm9, %v3417_v60, %v3929_v6  ;;  %v4249_v21 = vsel %vm3737_vm10, %v3481_v63, %v3993_v11 }
 0x1c3   :  { %v4058_v2 = vsel %vm3546_vm7, %v3290_v58, %v3802_v61  ;;  %v4122_v3 = vsel %vm3610_vm8, %v3354_v59, %v3866_v62  ;;  %v5574_v58 = vld [vmem:[%s7203_s0 + $0x3e8] sm:$0xff] }
 0x1c4   :  { %v5676_v4 = vpack.c.bf16 %v4058_v2, %v4057_v0  ;;  %v5836_v5 = vpack.c.bf16 %v4122_v3, %v4121_v1 }
 0x1c5   :  { %v2253_v7 = vpop.f32.mrf.mxu2  ;;  %v2413_v8 = vpop.f32.mrf.mxu3 }
 0x1c6   :  { %6236 = vst [vmem:[#allocation3 + $0x98] sm:$0xff] %v5676_v4   ;;  %v3418_v12 = vadd.f32 %v7006_v22, %v2253_v7  ;;  %v3482_v13 = vadd.f32 %v7006_v22, %v2413_v8  ;;  %v1936_v14 = vpop.f32.mrf.mxu0  ;;  %v2096_v15 = vpop.f32.mrf.mxu1 }
 0x1c7   :  { %6268 = vst [vmem:[#allocation3 + $0x198] sm:$0xff] %v5836_v5   ;;  %v3291_v27 = vadd.f32 %v7006_v22, %v1936_v14  ;;  %v3355_v28 = vadd.f32 %v7006_v22, %v2096_v15 }
 0x1c8   :  { %vm3674_vm11 = vcmp.ge.f32.partialorder %v3418_v12, 0.0  ;;  %v3930_v18 = vmul.f32 0.2, %v3418_v12  ;;  %vm3738_vm12 = vcmp.ge.f32.partialorder %v3482_v13, 0.0  ;;  %v3994_v19 = vmul.f32 0.2, %v3482_v13 }
 0x1c9   :  { %5349 = vmatmul.msk.bf16.gmra.mxu0 %vm1435_vm2, %v5477_v9  ;;  %5381 = vmatmul.msk.bf16.gmra.mxu1 %vm1435_vm2, %v5509_v10  ;;  %v3803_v32 = vmul.f32 0.2, %v3291_v27  ;;  %v3867_v33 = vmul.f32 0.2, %v3355_v28  ;;  %vm3547_vm13 = vcmp.ge.f32.partialorder %v3291_v27, 0.0  ;;  %vm3611_vm14 = vcmp.ge.f32.partialorder %v3355_v28, 0.0 }
 0x1ca   :  { %v4186_v23 = vsel %vm3674_vm11, %v3418_v12, %v3930_v18  ;;  %v4250_v24 = vsel %vm3738_vm12, %v3482_v13, %v3994_v19  ;;  %5413 = vmatmul.msk.bf16.gmra.mxu2 %vm1435_vm2, %v5541_v16  ;;  %5445 = vmatmul.msk.bf16.gmra.mxu3 %vm1435_vm2, %v5573_v17 }
 0x1cb   :  { %v5996_v25 = vpack.c.bf16 %v4186_v23, %v4185_v20  ;;  %v6156_v26 = vpack.c.bf16 %v4250_v24, %v4249_v21  ;;  %v4059_v40 = vsel %vm3547_vm13, %v3291_v27, %v3803_v32  ;;  %v4123_v41 = vsel %vm3611_vm14, %v3355_v28, %v3867_v33  ;;  %v5479_v27 = vld [vmem:[%s7203_s0 + $0xf0] sm:$0xff] }
 0x1cc   :  { %v5511_v28 = vld [vmem:[%s7203_s0 + $0x1f0] sm:$0xff] }
 0x1cd   :  { %6300 = vst [vmem:[#allocation3 + $0x298] sm:$0xff] %v5996_v25   ;;  %v2256_v29 = vpop.f32.mrf.mxu2  ;;  %v2416_v30 = vpop.f32.mrf.mxu3  ;;  %v5543_v33 = vld [vmem:[%s7203_s0 + $0x2f0] sm:$0xff] }
 0x1ce   :  { %6332 = vst [vmem:[#allocation3 + $0x398] sm:$0xff] %v6156_v26   ;;  %v1938_v31 = vpop.f32.mrf.mxu0  ;;  %v2098_v35 = vpop.f32.mrf.mxu1  ;;  %v3419_v37 = vadd.f32 %v7006_v22, %v2256_v29  ;;  %v3483_v39 = vadd.f32 %v7006_v22, %v2416_v30 }
 0x1cf   :  { %v3292_v34 = vadd.f32 %v7006_v22, %v1938_v31  ;;  %v3356_v36 = vadd.f32 %v7006_v22, %v2098_v35 }
 0x1d0   :  { %v3931_v47 = vmul.f32 0.2, %v3419_v37  ;;  %vm3675_vm1 = vcmp.ge.f32.partialorder %v3419_v37, 0.0  ;;  %v3995_v52 = vmul.f32 0.2, %v3483_v39  ;;  %vm3739_vm3 = vcmp.ge.f32.partialorder %v3483_v39, 0.0 }
 0x1d1   :  { %vm3548_vm15 = vcmp.ge.f32.partialorder %v3292_v34, 0.0  ;;  %v3804_v45 = vmul.f32 0.2, %v3292_v34  ;;  %vm3612_vm0 = vcmp.ge.f32.partialorder %v3356_v36, 0.0  ;;  %v3868_v38 = vmul.f32 0.2, %v3356_v36 }
 0x1d2   :  { %v4187_v61 = vsel %vm3675_vm1, %v3419_v37, %v3931_v47  ;;  %v4251_v62 = vsel %vm3739_vm3, %v3483_v39, %v3995_v52 }
 0x1d3   :  { %v4060_v42 = vsel %vm3548_vm15, %v3292_v34, %v3804_v45  ;;  %v4124_v43 = vsel %vm3612_vm0, %v3356_v36, %v3868_v38  ;;  %v5575_v34 = vld [vmem:[%s7203_s0 + $0x3f0] sm:$0xff] }
 0x1d4   :  { %v5681_v44 = vpack.c.bf16 %v4060_v42, %v4059_v40  ;;  %v5841_v46 = vpack.c.bf16 %v4124_v43, %v4123_v41 }
 0x1d5   :  { %v2258_v48 = vpop.f32.mrf.mxu2  ;;  %v2418_v49 = vpop.f32.mrf.mxu3 }
 0x1d6   :  { %6237 = vst [vmem:[#allocation3 + $0xa0] sm:$0xff] %v5681_v44   ;;  %v3420_v53 = vadd.f32 %v7006_v22, %v2258_v48  ;;  %v3484_v54 = vadd.f32 %v7006_v22, %v2418_v49  ;;  %v1941_v55 = vpop.f32.mrf.mxu0  ;;  %v2101_v56 = vpop.f32.mrf.mxu1 }
 0x1d7   :  { %6269 = vst [vmem:[#allocation3 + $0x1a0] sm:$0xff] %v5841_v46   ;;  %v3293_v3 = vadd.f32 %v7006_v22, %v1941_v55  ;;  %v3357_v4 = vadd.f32 %v7006_v22, %v2101_v56 }
 0x1d8   :  { %vm3676_vm4 = vcmp.ge.f32.partialorder %v3420_v53, 0.0  ;;  %v3932_v59 = vmul.f32 0.2, %v3420_v53  ;;  %vm3740_vm5 = vcmp.ge.f32.partialorder %v3484_v54, 0.0  ;;  %v3996_v60 = vmul.f32 0.2, %v3484_v54 }
 0x1d9   :  { %5350 = vmatmul.msk.bf16.gmra.mxu0 %vm1435_vm2, %v5478_v50  ;;  %5382 = vmatmul.msk.bf16.gmra.mxu1 %vm1435_vm2, %v5510_v51  ;;  %v3805_v9 = vmul.f32 0.2, %v3293_v3  ;;  %v3869_v10 = vmul.f32 0.2, %v3357_v4  ;;  %vm3549_vm6 = vcmp.ge.f32.partialorder %v3293_v3, 0.0  ;;  %vm3613_vm7 = vcmp.ge.f32.partialorder %v3357_v4, 0.0 }
 0x1da   :  { %v4188_v63 = vsel %vm3676_vm4, %v3420_v53, %v3932_v59  ;;  %v4252_v0 = vsel %vm3740_vm5, %v3484_v54, %v3996_v60  ;;  %5414 = vmatmul.msk.bf16.gmra.mxu2 %vm1435_vm2, %v5542_v57  ;;  %5446 = vmatmul.msk.bf16.gmra.mxu3 %vm1435_vm2, %v5574_v58 }
 0x1db   :  { %v6001_v1 = vpack.c.bf16 %v4188_v63, %v4187_v61  ;;  %v6161_v2 = vpack.c.bf16 %v4252_v0, %v4251_v62  ;;  %v4061_v17 = vsel %vm3549_vm6, %v3293_v3, %v3805_v9  ;;  %v4125_v18 = vsel %vm3613_vm7, %v3357_v4, %v3869_v10  ;;  %v5480_v3 = vld [vmem:[%s7203_s0 + $0xf8] sm:$0xff] }
 0x1dc   :  { %v5512_v4 = vld [vmem:[%s7203_s0 + $0x1f8] sm:$0xff] }
 0x1dd   :  { %6301 = vst [vmem:[#allocation3 + $0x2a0] sm:$0xff] %v6001_v1   ;;  %v2261_v5 = vpop.f32.mrf.mxu2  ;;  %v2421_v6 = vpop.f32.mrf.mxu3  ;;  %v5544_v10 = vld [vmem:[%s7203_s0 + $0x2f8] sm:$0xff] }
 0x1de   :  { %6333 = vst [vmem:[#allocation3 + $0x3a0] sm:$0xff] %v6161_v2   ;;  %v1943_v7 = vpop.f32.mrf.mxu0  ;;  %v2103_v8 = vpop.f32.mrf.mxu1  ;;  %v3421_v13 = vadd.f32 %v7006_v22, %v2261_v5  ;;  %v3485_v16 = vadd.f32 %v7006_v22, %v2421_v6 }
 0x1df   :  { %v3294_v11 = vadd.f32 %v7006_v22, %v1943_v7  ;;  %v3358_v12 = vadd.f32 %v7006_v22, %v2103_v8 }
 0x1e0   :  { %v3933_v24 = vmul.f32 0.2, %v3421_v13  ;;  %vm3677_vm10 = vcmp.ge.f32.partialorder %v3421_v13, 0.0  ;;  %v3997_v29 = vmul.f32 0.2, %v3485_v16  ;;  %vm3741_vm11 = vcmp.ge.f32.partialorder %v3485_v16, 0.0 }
 0x1e1   :  { %vm3550_vm8 = vcmp.ge.f32.partialorder %v3294_v11, 0.0  ;;  %v3806_v14 = vmul.f32 0.2, %v3294_v11  ;;  %vm3614_vm9 = vcmp.ge.f32.partialorder %v3358_v12, 0.0  ;;  %v3870_v15 = vmul.f32 0.2, %v3358_v12 }
 0x1e2   :  { %v4189_v45 = vsel %vm3677_vm10, %v3421_v13, %v3933_v24  ;;  %v4253_v38 = vsel %vm3741_vm11, %v3485_v16, %v3997_v29 }
 0x1e3   :  { %v4062_v19 = vsel %vm3550_vm8, %v3294_v11, %v3806_v14  ;;  %v4126_v20 = vsel %vm3614_vm9, %v3358_v12, %v3870_v15  ;;  %v5576_v11 = vld [vmem:[%s7203_s0 + $0x3f8] sm:$0xff] }
 0x1e4   :  { %v5686_v21 = vpack.c.bf16 %v4062_v19, %v4061_v17  ;;  %v5846_v23 = vpack.c.bf16 %v4126_v20, %v4125_v18 }
 0x1e5   :  { %v2263_v25 = vpop.f32.mrf.mxu2  ;;  %v2423_v26 = vpop.f32.mrf.mxu3 }
 0x1e6   :  { %6238 = vst [vmem:[#allocation3 + $0xa8] sm:$0xff] %v5686_v21   ;;  %v3422_v30 = vadd.f32 %v7006_v22, %v2263_v25  ;;  %v3486_v31 = vadd.f32 %v7006_v22, %v2423_v26  ;;  %v1946_v35 = vpop.f32.mrf.mxu0  ;;  %v2106_v32 = vpop.f32.mrf.mxu1 }
 0x1e7   :  { %6270 = vst [vmem:[#allocation3 + $0x1a8] sm:$0xff] %v5846_v23   ;;  %v3295_v43 = vadd.f32 %v7006_v22, %v1946_v35  ;;  %v3359_v44 = vadd.f32 %v7006_v22, %v2106_v32 }
 0x1e8   :  { %vm3678_vm12 = vcmp.ge.f32.partialorder %v3422_v30, 0.0  ;;  %v3934_v36 = vmul.f32 0.2, %v3422_v30  ;;  %vm3742_vm13 = vcmp.ge.f32.partialorder %v3486_v31, 0.0  ;;  %v3998_v37 = vmul.f32 0.2, %v3486_v31 }
 0x1e9   :  { %5351 = vmatmul.msk.bf16.gmra.mxu0 %vm1435_vm2, %v5479_v27  ;;  %5383 = vmatmul.msk.bf16.gmra.mxu1 %vm1435_vm2, %v5511_v28  ;;  %v3807_v50 = vmul.f32 0.2, %v3295_v43  ;;  %v3871_v51 = vmul.f32 0.2, %v3359_v44  ;;  %vm3551_vm14 = vcmp.ge.f32.partialorder %v3295_v43, 0.0  ;;  %vm3615_vm15 = vcmp.ge.f32.partialorder %v3359_v44, 0.0 }
 0x1ea   :  { %v4190_v39 = vsel %vm3678_vm12, %v3422_v30, %v3934_v36  ;;  %v4254_v40 = vsel %vm3742_vm13, %v3486_v31, %v3998_v37  ;;  %5415 = vmatmul.msk.bf16.gmra.mxu2 %vm1435_vm2, %v5543_v33  ;;  %5447 = vmatmul.msk.bf16.gmra.mxu3 %vm1435_vm2, %v5575_v34 }
 0x1eb   :  { %v6006_v41 = vpack.c.bf16 %v4190_v39, %v4189_v45  ;;  %v6166_v42 = vpack.c.bf16 %v4254_v40, %v4253_v38  ;;  %v4063_v58 = vsel %vm3551_vm14, %v3295_v43, %v3807_v50  ;;  %v4127_v59 = vsel %vm3615_vm15, %v3359_v44, %v3871_v51 }
 0x1ed   :  { %6302 = vst [vmem:[#allocation3 + $0x2a8] sm:$0xff] %v6006_v41   ;;  %v2266_v46 = vpop.f32.mrf.mxu2  ;;  %v2426_v47 = vpop.f32.mrf.mxu3 }
 0x1ee   :  { %6334 = vst [vmem:[#allocation3 + $0x3a8] sm:$0xff] %v6166_v42   ;;  %v1948_v48 = vpop.f32.mrf.mxu0  ;;  %v2108_v49 = vpop.f32.mrf.mxu1  ;;  %v3423_v54 = vadd.f32 %v7006_v22, %v2266_v46  ;;  %v3487_v57 = vadd.f32 %v7006_v22, %v2426_v47 }
 0x1ef   :  { %v3296_v52 = vadd.f32 %v7006_v22, %v1948_v48  ;;  %v3360_v53 = vadd.f32 %v7006_v22, %v2108_v49 }
 0x1f0   :  { %v3935_v0 = vmul.f32 0.2, %v3423_v54  ;;  %vm3679_vm3 = vcmp.ge.f32.partialorder %v3423_v54, 0.0  ;;  %v3999_v5 = vmul.f32 0.2, %v3487_v57  ;;  %vm3743_vm4 = vcmp.ge.f32.partialorder %v3487_v57, 0.0 }
 0x1f1   :  { %vm3552_vm0 = vcmp.ge.f32.partialorder %v3296_v52, 0.0  ;;  %v3808_v55 = vmul.f32 0.2, %v3296_v52  ;;  %vm3616_vm1 = vcmp.ge.f32.partialorder %v3360_v53, 0.0  ;;  %v3872_v56 = vmul.f32 0.2, %v3360_v53 }
 0x1f2   :  { %v4191_v14 = vsel %vm3679_vm3, %v3423_v54, %v3935_v0  ;;  %v4255_v15 = vsel %vm3743_vm4, %v3487_v57, %v3999_v5 }
 0x1f3   :  { %v4064_v60 = vsel %vm3552_vm0, %v3296_v52, %v3808_v55  ;;  %v4128_v61 = vsel %vm3616_vm1, %v3360_v53, %v3872_v56 }
 0x1f4   :  { %v5691_v62 = vpack.c.bf16 %v4064_v60, %v4063_v58  ;;  %v5851_v63 = vpack.c.bf16 %v4128_v61, %v4127_v59 }
 0x1f5   :  { %v2268_v1 = vpop.f32.mrf.mxu2  ;;  %v2428_v2 = vpop.f32.mrf.mxu3 }
 0x1f6   :  { %6239 = vst [vmem:[#allocation3 + $0xb0] sm:$0xff] %v5691_v62   ;;  %v3424_v6 = vadd.f32 %v7006_v22, %v2268_v1  ;;  %v3488_v7 = vadd.f32 %v7006_v22, %v2428_v2  ;;  %v1951_v8 = vpop.f32.mrf.mxu0  ;;  %v2111_v9 = vpop.f32.mrf.mxu1 }
 0x1f7   :  { %6271 = vst [vmem:[#allocation3 + $0x1b0] sm:$0xff] %v5851_v63   ;;  %v3297_v20 = vadd.f32 %v7006_v22, %v1951_v8  ;;  %v3361_v21 = vadd.f32 %v7006_v22, %v2111_v9 }
 0x1f8   :  { %vm3680_vm5 = vcmp.ge.f32.partialorder %v3424_v6, 0.0  ;;  %v3936_v12 = vmul.f32 0.2, %v3424_v6  ;;  %vm3744_vm6 = vcmp.ge.f32.partialorder %v3488_v7, 0.0  ;;  %v4000_v13 = vmul.f32 0.2, %v3488_v7 }
 0x1f9   :  { %5352 = vmatmul.msk.bf16.gmra.mxu0 %vm1435_vm2, %v5480_v3  ;;  %5384 = vmatmul.msk.bf16.gmra.mxu1 %vm1435_vm2, %v5512_v4  ;;  %v3809_v27 = vmul.f32 0.2, %v3297_v20  ;;  %v3873_v28 = vmul.f32 0.2, %v3361_v21  ;;  %vm3553_vm7 = vcmp.ge.f32.partialorder %v3297_v20, 0.0 }
 0x1fa   :  { %v4192_v16 = vsel %vm3680_vm5, %v3424_v6, %v3936_v12  ;;  %v4256_v17 = vsel %vm3744_vm6, %v3488_v7, %v4000_v13  ;;  %5416 = vmatmul.msk.bf16.gmra.mxu2 %vm1435_vm2, %v5544_v10  ;;  %5448 = vmatmul.msk.bf16.gmra.mxu3 %vm1435_vm2, %v5576_v11  ;;  %vm3617_vm2 = vcmp.ge.f32.partialorder %v3361_v21, 0.0 }
 0x1fb   :  { %v6011_v18 = vpack.c.bf16 %v4192_v16, %v4191_v14  ;;  %v6171_v19 = vpack.c.bf16 %v4256_v17, %v4255_v15  ;;  %v4065_v34 = vsel %vm3553_vm7, %v3297_v20, %v3809_v27  ;;  %v4129_v36 = vsel %vm3617_vm2, %v3361_v21, %v3873_v28 }
 0x1fd   :  { %6303 = vst [vmem:[#allocation3 + $0x2b0] sm:$0xff] %v6011_v18   ;;  %v2271_v23 = vpop.f32.mrf.mxu2  ;;  %v2431_v24 = vpop.f32.mrf.mxu3 }
 0x1fe   :  { %6335 = vst [vmem:[#allocation3 + $0x3b0] sm:$0xff] %v6171_v19   ;;  %v1953_v25 = vpop.f32.mrf.mxu0  ;;  %v2113_v26 = vpop.f32.mrf.mxu1  ;;  %v3425_v32 = vadd.f32 %v7006_v22, %v2271_v23  ;;  %v3489_v33 = vadd.f32 %v7006_v22, %v2431_v24 }
 0x1ff   :  { %v3298_v29 = vadd.f32 %v7006_v22, %v1953_v25  ;;  %v3362_v30 = vadd.f32 %v7006_v22, %v2113_v26 }
 0x200   :  { %v3937_v42 = vmul.f32 0.2, %v3425_v32  ;;  %v4001_v43 = vmul.f32 0.2, %v3489_v33  ;;  %vm3681_vm10 = vcmp.ge.f32.partialorder %v3425_v32, 0.0  ;;  %vm3745_vm11 = vcmp.ge.f32.partialorder %v3489_v33, 0.0 }
 0x201   :  { %vm3554_vm8 = vcmp.ge.f32.partialorder %v3298_v29, 0.0  ;;  %v3810_v31 = vmul.f32 0.2, %v3298_v29  ;;  %vm3618_vm9 = vcmp.ge.f32.partialorder %v3362_v30, 0.0  ;;  %v3874_v35 = vmul.f32 0.2, %v3362_v30 }
 0x202   :  { %v4193_v51 = vsel %vm3681_vm10, %v3425_v32, %v3937_v42  ;;  %v4257_v52 = vsel %vm3745_vm11, %v3489_v33, %v4001_v43 }
 0x203   :  { %v4066_v37 = vsel %vm3554_vm8, %v3298_v29, %v3810_v31  ;;  %v4130_v45 = vsel %vm3618_vm9, %v3362_v30, %v3874_v35 }
 0x204   :  { %v5696_v38 = vpack.c.bf16 %v4066_v37, %v4065_v34  ;;  %v5856_v39 = vpack.c.bf16 %v4130_v45, %v4129_v36 }
 0x205   :  { %v2273_v40 = vpop.f32.mrf.mxu2  ;;  %v2433_v41 = vpop.f32.mrf.mxu3 }
 0x206   :  { %6240 = vst [vmem:[#allocation3 + $0xb8] sm:$0xff] %v5696_v38   ;;  %v3426_v44 = vadd.f32 %v7006_v22, %v2273_v40  ;;  %v3490_v46 = vadd.f32 %v7006_v22, %v2433_v41  ;;  %v1956_v47 = vpop.f32.mrf.mxu0  ;;  %v2116_v48 = vpop.f32.mrf.mxu1 }
 0x207   :  { %6272 = vst [vmem:[#allocation3 + $0x1b8] sm:$0xff] %v5856_v39   ;;  %v3299_v57 = vadd.f32 %v7006_v22, %v1956_v47  ;;  %v3363_v58 = vadd.f32 %v7006_v22, %v2116_v48 }
 0x208   :  { %vm3682_vm12 = vcmp.ge.f32.partialorder %v3426_v44, 0.0  ;;  %v3938_v49 = vmul.f32 0.2, %v3426_v44  ;;  %vm3746_vm13 = vcmp.ge.f32.partialorder %v3490_v46, 0.0  ;;  %v4002_v50 = vmul.f32 0.2, %v3490_v46 }
 0x209   :  { %v3811_v63 = vmul.f32 0.2, %v3299_v57  ;;  %v3875_v0 = vmul.f32 0.2, %v3363_v58  ;;  %vm3555_vm14 = vcmp.ge.f32.partialorder %v3299_v57, 0.0  ;;  %vm3619_vm15 = vcmp.ge.f32.partialorder %v3363_v58, 0.0 }
 0x20a   :  { %v4194_v53 = vsel %vm3682_vm12, %v3426_v44, %v3938_v49  ;;  %v4258_v54 = vsel %vm3746_vm13, %v3490_v46, %v4002_v50 }
 0x20b   :  { %v6016_v55 = vpack.c.bf16 %v4194_v53, %v4193_v51  ;;  %v6176_v56 = vpack.c.bf16 %v4258_v54, %v4257_v52  ;;  %v4067_v7 = vsel %vm3555_vm14, %v3299_v57, %v3811_v63  ;;  %v4131_v8 = vsel %vm3619_vm15, %v3363_v58, %v3875_v0 }
 0x20d   :  { %6304 = vst [vmem:[#allocation3 + $0x2b8] sm:$0xff] %v6016_v55   ;;  %v2276_v59 = vpop.f32.mrf.mxu2  ;;  %v2436_v60 = vpop.f32.mrf.mxu3 }
 0x20e   :  { %6336 = vst [vmem:[#allocation3 + $0x3b8] sm:$0xff] %v6176_v56   ;;  %v1958_v61 = vpop.f32.mrf.mxu0  ;;  %v2118_v62 = vpop.f32.mrf.mxu1  ;;  %v3427_v5 = vadd.f32 %v7006_v22, %v2276_v59  ;;  %v3491_v6 = vadd.f32 %v7006_v22, %v2436_v60 }
 0x20f   :  { %v3300_v1 = vadd.f32 %v7006_v22, %v1958_v61  ;;  %v3364_v2 = vadd.f32 %v7006_v22, %v2118_v62 }
 0x210   :  { %v3939_v15 = vmul.f32 0.2, %v3427_v5  ;;  %v4003_v16 = vmul.f32 0.2, %v3491_v6  ;;  %vm3683_vm3 = vcmp.ge.f32.partialorder %v3427_v5, 0.0  ;;  %vm3747_vm4 = vcmp.ge.f32.partialorder %v3491_v6, 0.0 }
 0x211   :  { %vm3556_vm0 = vcmp.ge.f32.partialorder %v3300_v1, 0.0  ;;  %v3812_v3 = vmul.f32 0.2, %v3300_v1  ;;  %vm3620_vm1 = vcmp.ge.f32.partialorder %v3364_v2, 0.0  ;;  %v3876_v4 = vmul.f32 0.2, %v3364_v2 }
 0x212   :  { %v4195_v24 = vsel %vm3683_vm3, %v3427_v5, %v3939_v15  ;;  %v4259_v25 = vsel %vm3747_vm4, %v3491_v6, %v4003_v16 }
 0x213   :  { %v4068_v9 = vsel %vm3556_vm0, %v3300_v1, %v3812_v3  ;;  %v4132_v10 = vsel %vm3620_vm1, %v3364_v2, %v3876_v4 }
 0x214   :  { %v5701_v11 = vpack.c.bf16 %v4068_v9, %v4067_v7  ;;  %v5861_v12 = vpack.c.bf16 %v4132_v10, %v4131_v8 }
 0x215   :  { %v2278_v13 = vpop.f32.mrf.mxu2  ;;  %v2438_v14 = vpop.f32.mrf.mxu3 }
 0x216   :  { %6241 = vst [vmem:[#allocation3 + $0xc0] sm:$0xff] %v5701_v11   ;;  %v3428_v17 = vadd.f32 %v7006_v22, %v2278_v13  ;;  %v3492_v18 = vadd.f32 %v7006_v22, %v2438_v14  ;;  %v1961_v19 = vpop.f32.mrf.mxu0  ;;  %v2121_v20 = vpop.f32.mrf.mxu1 }
 0x217   :  { %6273 = vst [vmem:[#allocation3 + $0x1c0] sm:$0xff] %v5861_v12   ;;  %v3301_v30 = vadd.f32 %v7006_v22, %v1961_v19  ;;  %v3365_v31 = vadd.f32 %v7006_v22, %v2121_v20 }
 0x218   :  { %vm3684_vm5 = vcmp.ge.f32.partialorder %v3428_v17, 0.0  ;;  %v3940_v21 = vmul.f32 0.2, %v3428_v17  ;;  %vm3748_vm6 = vcmp.ge.f32.partialorder %v3492_v18, 0.0  ;;  %v4004_v23 = vmul.f32 0.2, %v3492_v18 }
 0x219   :  { %v3813_v36 = vmul.f32 0.2, %v3301_v30  ;;  %v3877_v37 = vmul.f32 0.2, %v3365_v31  ;;  %vm3557_vm7 = vcmp.ge.f32.partialorder %v3301_v30, 0.0  ;;  %vm3621_vm2 = vcmp.ge.f32.partialorder %v3365_v31, 0.0 }
 0x21a   :  { %v4196_v26 = vsel %vm3684_vm5, %v3428_v17, %v3940_v21  ;;  %v4260_v27 = vsel %vm3748_vm6, %v3492_v18, %v4004_v23 }
 0x21b   :  { %v6021_v28 = vpack.c.bf16 %v4196_v26, %v4195_v24  ;;  %v6181_v29 = vpack.c.bf16 %v4260_v27, %v4259_v25  ;;  %v4069_v43 = vsel %vm3557_vm7, %v3301_v30, %v3813_v36  ;;  %v4133_v44 = vsel %vm3621_vm2, %v3365_v31, %v3877_v37 }
 0x21d   :  { %6305 = vst [vmem:[#allocation3 + $0x2c0] sm:$0xff] %v6021_v28   ;;  %v2281_v35 = vpop.f32.mrf.mxu2  ;;  %v2441_v32 = vpop.f32.mrf.mxu3 }
 0x21e   :  { %6337 = vst [vmem:[#allocation3 + $0x3c0] sm:$0xff] %v6181_v29   ;;  %v1963_v33 = vpop.f32.mrf.mxu0  ;;  %v2123_v34 = vpop.f32.mrf.mxu1  ;;  %v3429_v41 = vadd.f32 %v7006_v22, %v2281_v35  ;;  %v3493_v42 = vadd.f32 %v7006_v22, %v2441_v32 }
 0x21f   :  { %v3302_v45 = vadd.f32 %v7006_v22, %v1963_v33  ;;  %v3366_v38 = vadd.f32 %v7006_v22, %v2123_v34 }
 0x220   :  { %v3941_v52 = vmul.f32 0.2, %v3429_v41  ;;  %v4005_v53 = vmul.f32 0.2, %v3493_v42  ;;  %vm3685_vm10 = vcmp.ge.f32.partialorder %v3429_v41, 0.0  ;;  %vm3749_vm11 = vcmp.ge.f32.partialorder %v3493_v42, 0.0 }
 0x221   :  { %vm3558_vm8 = vcmp.ge.f32.partialorder %v3302_v45, 0.0  ;;  %v3814_v39 = vmul.f32 0.2, %v3302_v45  ;;  %vm3622_vm9 = vcmp.ge.f32.partialorder %v3366_v38, 0.0  ;;  %v3878_v40 = vmul.f32 0.2, %v3366_v38 }
 0x222   :  { %v4197_v60 = vsel %vm3685_vm10, %v3429_v41, %v3941_v52  ;;  %v4261_v61 = vsel %vm3749_vm11, %v3493_v42, %v4005_v53 }
 0x223   :  { %v4070_v46 = vsel %vm3558_vm8, %v3302_v45, %v3814_v39  ;;  %v4134_v47 = vsel %vm3622_vm9, %v3366_v38, %v3878_v40 }
 0x224   :  { %v5706_v48 = vpack.c.bf16 %v4070_v46, %v4069_v43  ;;  %v5866_v49 = vpack.c.bf16 %v4134_v47, %v4133_v44 }
 0x225   :  { %v2283_v50 = vpop.f32.mrf.mxu2  ;;  %v2443_v51 = vpop.f32.mrf.mxu3 }
 0x226   :  { %6242 = vst [vmem:[#allocation3 + $0xc8] sm:$0xff] %v5706_v48   ;;  %v3430_v54 = vadd.f32 %v7006_v22, %v2283_v50  ;;  %v3494_v55 = vadd.f32 %v7006_v22, %v2443_v51  ;;  %v1966_v56 = vpop.f32.mrf.mxu0  ;;  %v2126_v57 = vpop.f32.mrf.mxu1 }
 0x227   :  { %6274 = vst [vmem:[#allocation3 + $0x1c8] sm:$0xff] %v5866_v49   ;;  %v3303_v2 = vadd.f32 %v7006_v22, %v1966_v56  ;;  %v3367_v3 = vadd.f32 %v7006_v22, %v2126_v57 }
 0x228   :  { %vm3686_vm12 = vcmp.ge.f32.partialorder %v3430_v54, 0.0  ;;  %v3942_v58 = vmul.f32 0.2, %v3430_v54  ;;  %vm3750_vm13 = vcmp.ge.f32.partialorder %v3494_v55, 0.0  ;;  %v4006_v59 = vmul.f32 0.2, %v3494_v55 }
 0x229   :  { %v3815_v8 = vmul.f32 0.2, %v3303_v2  ;;  %v3879_v9 = vmul.f32 0.2, %v3367_v3  ;;  %vm3559_vm14 = vcmp.ge.f32.partialorder %v3303_v2, 0.0  ;;  %vm3623_vm15 = vcmp.ge.f32.partialorder %v3367_v3, 0.0 }
 0x22a   :  { %v4198_v62 = vsel %vm3686_vm12, %v3430_v54, %v3942_v58  ;;  %v4262_v63 = vsel %vm3750_vm13, %v3494_v55, %v4006_v59 }
 0x22b   :  { %v6026_v0 = vpack.c.bf16 %v4198_v62, %v4197_v60  ;;  %v6186_v1 = vpack.c.bf16 %v4262_v63, %v4261_v61  ;;  %v4071_v16 = vsel %vm3559_vm14, %v3303_v2, %v3815_v8  ;;  %v4135_v17 = vsel %vm3623_vm15, %v3367_v3, %v3879_v9 }
 0x22d   :  { %6306 = vst [vmem:[#allocation3 + $0x2c8] sm:$0xff] %v6026_v0   ;;  %v2286_v4 = vpop.f32.mrf.mxu2  ;;  %v2446_v5 = vpop.f32.mrf.mxu3 }
 0x22e   :  { %6338 = vst [vmem:[#allocation3 + $0x3c8] sm:$0xff] %v6186_v1   ;;  %v1968_v6 = vpop.f32.mrf.mxu0  ;;  %v2128_v7 = vpop.f32.mrf.mxu1  ;;  %v3431_v14 = vadd.f32 %v7006_v22, %v2286_v4  ;;  %v3495_v15 = vadd.f32 %v7006_v22, %v2446_v5 }
 0x22f   :  { %v3304_v10 = vadd.f32 %v7006_v22, %v1968_v6  ;;  %v3368_v11 = vadd.f32 %v7006_v22, %v2128_v7 }
 0x230   :  { %v3943_v25 = vmul.f32 0.2, %v3431_v14  ;;  %v4007_v26 = vmul.f32 0.2, %v3495_v15  ;;  %vm3687_vm3 = vcmp.ge.f32.partialorder %v3431_v14, 0.0  ;;  %vm3751_vm4 = vcmp.ge.f32.partialorder %v3495_v15, 0.0 }
 0x231   :  { %vm3560_vm0 = vcmp.ge.f32.partialorder %v3304_v10, 0.0  ;;  %v3816_v12 = vmul.f32 0.2, %v3304_v10  ;;  %vm3624_vm1 = vcmp.ge.f32.partialorder %v3368_v11, 0.0  ;;  %v3880_v13 = vmul.f32 0.2, %v3368_v11 }
 0x232   :  { %v4199_v32 = vsel %vm3687_vm3, %v3431_v14, %v3943_v25  ;;  %v4263_v33 = vsel %vm3751_vm4, %v3495_v15, %v4007_v26 }
 0x233   :  { %v4072_v18 = vsel %vm3560_vm0, %v3304_v10, %v3816_v12  ;;  %v4136_v19 = vsel %vm3624_vm1, %v3368_v11, %v3880_v13 }
 0x234   :  { %v5711_v20 = vpack.c.bf16 %v4072_v18, %v4071_v16  ;;  %v5871_v21 = vpack.c.bf16 %v4136_v19, %v4135_v17 }
 0x235   :  { %v2288_v23 = vpop.f32.mrf.mxu2  ;;  %v2448_v24 = vpop.f32.mrf.mxu3 }
 0x236   :  { %6243 = vst [vmem:[#allocation3 + $0xd0] sm:$0xff] %v5711_v20   ;;  %v3432_v27 = vadd.f32 %v7006_v22, %v2288_v23  ;;  %v3496_v28 = vadd.f32 %v7006_v22, %v2448_v24  ;;  %v1971_v29 = vpop.f32.mrf.mxu0  ;;  %v2131_v30 = vpop.f32.mrf.mxu1  ;;  %v7169_v20 = vld [vmem:[%s7205_s2] ss:$0 sm:$0xff]  ;;  %s6383_s2 = smov [#allocation3]  }
 0x237   :  { %6275 = vst [vmem:[#allocation3 + $0x1d0] sm:$0xff] %v5871_v21   ;;  %v3305_v38 = vadd.f32 %v7006_v22, %v1971_v29  ;;  %v3369_v39 = vadd.f32 %v7006_v22, %v2131_v30  ;;  %s4791_s26 = sshll.u32 %s6383_s2, 4  ;;  %s4792_s26 = int_to_ptr.vmem [resolvable:$true] %s4791_s26 }
 0x238   :  { %vm3688_vm5 = vcmp.ge.f32.partialorder %v3432_v27, 0.0  ;;  %v3944_v31 = vmul.f32 0.2, %v3432_v27  ;;  %vm3752_vm6 = vcmp.ge.f32.partialorder %v3496_v28, 0.0  ;;  %v4008_v35 = vmul.f32 0.2, %v3496_v28 }
 0x239   :  { %v3817_v44 = vmul.f32 0.2, %v3305_v38  ;;  %v3881_v46 = vmul.f32 0.2, %v3369_v39  ;;  %vm3561_vm7 = vcmp.ge.f32.partialorder %v3305_v38, 0.0  ;;  %vm3625_vm2 = vcmp.ge.f32.partialorder %v3369_v39, 0.0 }
 0x23a   :  { %v4200_v34 = vsel %vm3688_vm5, %v3432_v27, %v3944_v31  ;;  %v4264_v36 = vsel %vm3752_vm6, %v3496_v28, %v4008_v35 }
 0x23b   :  { %v6031_v37 = vpack.c.bf16 %v4200_v34, %v4199_v32  ;;  %v6191_v45 = vpack.c.bf16 %v4264_v36, %v4263_v33  ;;  %v4073_v53 = vsel %vm3561_vm7, %v3305_v38, %v3817_v44  ;;  %v4137_v54 = vsel %vm3625_vm2, %v3369_v39, %v3881_v46 }
 0x23d   :  { %6307 = vst [vmem:[#allocation3 + $0x2d0] sm:$0xff] %v6031_v37   ;;  %v2291_v40 = vpop.f32.mrf.mxu2  ;;  %v2451_v41 = vpop.f32.mrf.mxu3 }
 0x23e   :  { %6339 = vst [vmem:[#allocation3 + $0x3d0] sm:$0xff] %v6191_v45   ;;  %v1973_v42 = vpop.f32.mrf.mxu0  ;;  %v2133_v43 = vpop.f32.mrf.mxu1  ;;  %v3433_v51 = vadd.f32 %v7006_v22, %v2291_v40  ;;  %v3497_v52 = vadd.f32 %v7006_v22, %v2451_v41 }
 0x23f   :  { %v3306_v47 = vadd.f32 %v7006_v22, %v1973_v42  ;;  %v3370_v48 = vadd.f32 %v7006_v22, %v2133_v43 }
 0x240   :  { %v3945_v61 = vmul.f32 0.2, %v3433_v51  ;;  %v4009_v62 = vmul.f32 0.2, %v3497_v52  ;;  %vm3689_vm10 = vcmp.ge.f32.partialorder %v3433_v51, 0.0  ;;  %vm3753_vm11 = vcmp.ge.f32.partialorder %v3497_v52, 0.0 }
 0x241   :  { %vm3562_vm8 = vcmp.ge.f32.partialorder %v3306_v47, 0.0  ;;  %v3818_v49 = vmul.f32 0.2, %v3306_v47  ;;  %vm3626_vm9 = vcmp.ge.f32.partialorder %v3370_v48, 0.0  ;;  %v3882_v50 = vmul.f32 0.2, %v3370_v48 }
 0x242   :  { %v4201_v5 = vsel %vm3689_vm10, %v3433_v51, %v3945_v61  ;;  %v4265_v6 = vsel %vm3753_vm11, %v3497_v52, %v4009_v62 }
 0x243   :  { %v4074_v55 = vsel %vm3562_vm8, %v3306_v47, %v3818_v49  ;;  %v4138_v56 = vsel %vm3626_vm9, %v3370_v48, %v3882_v50 }
 0x244   :  { %v5716_v57 = vpack.c.bf16 %v4074_v55, %v4073_v53  ;;  %v5876_v58 = vpack.c.bf16 %v4138_v56, %v4137_v54 }
 0x245   :  { %v2293_v59 = vpop.f32.mrf.mxu2  ;;  %v2453_v60 = vpop.f32.mrf.mxu3 }
 0x246   :  { %6244 = vst [vmem:[#allocation3 + $0xd8] sm:$0xff] %v5716_v57   ;;  %v3434_v63 = vadd.f32 %v7006_v22, %v2293_v59  ;;  %v3498_v0 = vadd.f32 %v7006_v22, %v2453_v60  ;;  %v1976_v1 = vpop.f32.mrf.mxu0  ;;  %v2136_v2 = vpop.f32.mrf.mxu1 }
 0x247   :  { %6276 = vst [vmem:[#allocation3 + $0x1d8] sm:$0xff] %v5876_v58   ;;  %v3307_v11 = vadd.f32 %v7006_v22, %v1976_v1  ;;  %v3371_v12 = vadd.f32 %v7006_v22, %v2136_v2 }
 0x248   :  { %vm3690_vm12 = vcmp.ge.f32.partialorder %v3434_v63, 0.0  ;;  %v3946_v3 = vmul.f32 0.2, %v3434_v63  ;;  %vm3754_vm13 = vcmp.ge.f32.partialorder %v3498_v0, 0.0  ;;  %v4010_v4 = vmul.f32 0.2, %v3498_v0 }
 0x249   :  { %v3819_v17 = vmul.f32 0.2, %v3307_v11  ;;  %v3883_v18 = vmul.f32 0.2, %v3371_v12  ;;  %vm3563_vm14 = vcmp.ge.f32.partialorder %v3307_v11, 0.0  ;;  %vm3627_vm15 = vcmp.ge.f32.partialorder %v3371_v12, 0.0 }
 0x24a   :  { %v4202_v7 = vsel %vm3690_vm12, %v3434_v63, %v3946_v3  ;;  %v4266_v8 = vsel %vm3754_vm13, %v3498_v0, %v4010_v4 }
 0x24b   :  { %v6036_v9 = vpack.c.bf16 %v4202_v7, %v4201_v5  ;;  %v6196_v10 = vpack.c.bf16 %v4266_v8, %v4265_v6  ;;  %v4075_v27 = vsel %vm3563_vm14, %v3307_v11, %v3819_v17  ;;  %v4139_v28 = vsel %vm3627_vm15, %v3371_v12, %v3883_v18 }
 0x24d   :  { %6308 = vst [vmem:[#allocation3 + $0x2d8] sm:$0xff] %v6036_v9   ;;  %v2296_v13 = vpop.f32.mrf.mxu2  ;;  %v2456_v14 = vpop.f32.mrf.mxu3 }
 0x24e   :  { %6340 = vst [vmem:[#allocation3 + $0x3d8] sm:$0xff] %v6196_v10   ;;  %v1978_v15 = vpop.f32.mrf.mxu0  ;;  %v2138_v16 = vpop.f32.mrf.mxu1  ;;  %v3435_v25 = vadd.f32 %v7169_v20, %v2296_v13  ;;  %v3499_v26 = vadd.f32 %v7169_v20, %v2456_v14 }
 0x24f   :  { %v3308_v19 = vadd.f32 %v7006_v22, %v1978_v15  ;;  %v3372_v21 = vadd.f32 %v7169_v20, %v2138_v16 }
 0x250   :  { %v3947_v33 = vmul.f32 0.2, %v3435_v25  ;;  %v4011_v34 = vmul.f32 0.2, %v3499_v26  ;;  %vm3691_vm3 = vcmp.ge.f32.partialorder %v3435_v25, 0.0  ;;  %vm3755_vm4 = vcmp.ge.f32.partialorder %v3499_v26, 0.0 }
 0x251   :  { %vm3564_vm0 = vcmp.ge.f32.partialorder %v3308_v19, 0.0  ;;  %v3820_v23 = vmul.f32 0.2, %v3308_v19  ;;  %vm3628_vm1 = vcmp.ge.f32.partialorder %v3372_v21, 0.0  ;;  %v3884_v24 = vmul.f32 0.2, %v3372_v21 }
 0x252   :  { %v4203_v41 = vsel %vm3691_vm3, %v3435_v25, %v3947_v33  ;;  %v4267_v42 = vsel %vm3755_vm4, %v3499_v26, %v4011_v34 }
 0x253   :  { %v4076_v22 = vsel %vm3564_vm0, %v3308_v19, %v3820_v23  ;;  %v4140_v29 = vsel %vm3628_vm1, %v3372_v21, %v3884_v24 }
 0x254   :  { %v5721_v30 = vpack.c.bf16 %v4076_v22, %v4075_v27  ;;  %v5881_v31 = vpack.c.bf16 %v4140_v29, %v4139_v28 }
 0x255   :  { %v2298_v35 = vpop.f32.mrf.mxu2  ;;  %v2458_v32 = vpop.f32.mrf.mxu3 }
 0x256   :  { %6245 = vst [vmem:[#allocation3 + $0xe0] sm:$0xff] %v5721_v30   ;;  %v3436_v36 = vadd.f32 %v7169_v20, %v2298_v35  ;;  %v3500_v37 = vadd.f32 %v7169_v20, %v2458_v32  ;;  %v1981_v45 = vpop.f32.mrf.mxu0  ;;  %v2141_v38 = vpop.f32.mrf.mxu1 }
 0x257   :  { %6277 = vst [vmem:[#allocation3 + $0x1e0] sm:$0xff] %v5881_v31   ;;  %v3309_v48 = vadd.f32 %v7169_v20, %v1981_v45  ;;  %v3373_v49 = vadd.f32 %v7169_v20, %v2141_v38 }
 0x258   :  { %vm3692_vm5 = vcmp.ge.f32.partialorder %v3436_v36, 0.0  ;;  %v3948_v39 = vmul.f32 0.2, %v3436_v36  ;;  %vm3756_vm6 = vcmp.ge.f32.partialorder %v3500_v37, 0.0  ;;  %v4012_v40 = vmul.f32 0.2, %v3500_v37 }
 0x259   :  { %v3821_v54 = vmul.f32 0.2, %v3309_v48  ;;  %v3885_v55 = vmul.f32 0.2, %v3373_v49  ;;  %vm3565_vm7 = vcmp.ge.f32.partialorder %v3309_v48, 0.0  ;;  %vm3629_vm2 = vcmp.ge.f32.partialorder %v3373_v49, 0.0 }
 0x25a   :  { %v4204_v43 = vsel %vm3692_vm5, %v3436_v36, %v3948_v39  ;;  %v4268_v44 = vsel %vm3756_vm6, %v3500_v37, %v4012_v40 }
 0x25b   :  { %v6041_v46 = vpack.c.bf16 %v4204_v43, %v4203_v41  ;;  %v6201_v47 = vpack.c.bf16 %v4268_v44, %v4267_v42  ;;  %v4077_v62 = vsel %vm3565_vm7, %v3309_v48, %v3821_v54  ;;  %v4141_v63 = vsel %vm3629_vm2, %v3373_v49, %v3885_v55 }
 0x25d   :  { %6309 = vst [vmem:[#allocation3 + $0x2e0] sm:$0xff] %v6041_v46   ;;  %v2301_v50 = vpop.f32.mrf.mxu2  ;;  %v2461_v51 = vpop.f32.mrf.mxu3 }
 0x25e   :  { %6341 = vst [vmem:[#allocation3 + $0x3e0] sm:$0xff] %v6201_v47   ;;  %v1983_v52 = vpop.f32.mrf.mxu0  ;;  %v2143_v53 = vpop.f32.mrf.mxu1  ;;  %v3437_v60 = vadd.f32 %v7169_v20, %v2301_v50  ;;  %v3501_v61 = vadd.f32 %v7169_v20, %v2461_v51 }
 0x25f   :  { %v3310_v56 = vadd.f32 %v7169_v20, %v1983_v52  ;;  %v3374_v57 = vadd.f32 %v7169_v20, %v2143_v53 }
 0x260   :  { %v3949_v6 = vmul.f32 0.2, %v3437_v60  ;;  %v4013_v7 = vmul.f32 0.2, %v3501_v61  ;;  %vm3693_vm10 = vcmp.ge.f32.partialorder %v3437_v60, 0.0  ;;  %vm3757_vm11 = vcmp.ge.f32.partialorder %v3501_v61, 0.0 }
 0x261   :  { %vm3566_vm8 = vcmp.ge.f32.partialorder %v3310_v56, 0.0  ;;  %v3822_v58 = vmul.f32 0.2, %v3310_v56  ;;  %vm3630_vm9 = vcmp.ge.f32.partialorder %v3374_v57, 0.0  ;;  %v3886_v59 = vmul.f32 0.2, %v3374_v57 }
 0x262   :  { %v4205_v14 = vsel %vm3693_vm10, %v3437_v60, %v3949_v6  ;;  %v4269_v15 = vsel %vm3757_vm11, %v3501_v61, %v4013_v7 }
 0x263   :  { %v4078_v0 = vsel %vm3566_vm8, %v3310_v56, %v3822_v58  ;;  %v4142_v1 = vsel %vm3630_vm9, %v3374_v57, %v3886_v59 }
 0x264   :  { %v5726_v2 = vpack.c.bf16 %v4078_v0, %v4077_v62  ;;  %v5886_v3 = vpack.c.bf16 %v4142_v1, %v4141_v63 }
 0x265   :  { %v2303_v4 = vpop.f32.mrf.mxu2  ;;  %v2463_v5 = vpop.f32.mrf.mxu3 }
 0x266   :  { %6246 = vst [vmem:[#allocation3 + $0xe8] sm:$0xff] %v5726_v2   ;;  %v3438_v8 = vadd.f32 %v7169_v20, %v2303_v4  ;;  %v3502_v9 = vadd.f32 %v7169_v20, %v2463_v5  ;;  %v1986_v10 = vpop.f32.mrf.mxu0  ;;  %v2146_v11 = vpop.f32.mrf.mxu1 }
 0x267   :  { %6278 = vst [vmem:[#allocation3 + $0x1e8] sm:$0xff] %v5886_v3   ;;  %v3311_v21 = vadd.f32 %v7169_v20, %v1986_v10  ;;  %v3375_v23 = vadd.f32 %v7169_v20, %v2146_v11 }
 0x268   :  { %vm3694_vm12 = vcmp.ge.f32.partialorder %v3438_v8, 0.0  ;;  %v3950_v12 = vmul.f32 0.2, %v3438_v8  ;;  %vm3758_vm13 = vcmp.ge.f32.partialorder %v3502_v9, 0.0  ;;  %v4014_v13 = vmul.f32 0.2, %v3502_v9 }
 0x269   :  { %v3823_v28 = vmul.f32 0.2, %v3311_v21  ;;  %v3887_v22 = vmul.f32 0.2, %v3375_v23  ;;  %vm3567_vm14 = vcmp.ge.f32.partialorder %v3311_v21, 0.0  ;;  %vm3631_vm15 = vcmp.ge.f32.partialorder %v3375_v23, 0.0 }
 0x26a   :  { %v4206_v16 = vsel %vm3694_vm12, %v3438_v8, %v3950_v12  ;;  %v4270_v17 = vsel %vm3758_vm13, %v3502_v9, %v4014_v13 }
 0x26b   :  { %v6046_v18 = vpack.c.bf16 %v4206_v16, %v4205_v14  ;;  %v6206_v19 = vpack.c.bf16 %v4270_v17, %v4269_v15  ;;  %v4079_v34 = vsel %vm3567_vm14, %v3311_v21, %v3823_v28  ;;  %v4143_v36 = vsel %vm3631_vm15, %v3375_v23, %v3887_v22 }
 0x26d   :  { %6310 = vst [vmem:[#allocation3 + $0x2e8] sm:$0xff] %v6046_v18   ;;  %v2306_v24 = vpop.f32.mrf.mxu2  ;;  %v2466_v25 = vpop.f32.mrf.mxu3 }
 0x26e   :  { %6342 = vst [vmem:[#allocation3 + $0x3e8] sm:$0xff] %v6206_v19   ;;  %v1988_v26 = vpop.f32.mrf.mxu0  ;;  %v2148_v27 = vpop.f32.mrf.mxu1  ;;  %v3439_v32 = vadd.f32 %v7169_v20, %v2306_v24  ;;  %v3503_v33 = vadd.f32 %v7169_v20, %v2466_v25 }
 0x26f   :  { %v3312_v29 = vadd.f32 %v7169_v20, %v1988_v26  ;;  %v3376_v30 = vadd.f32 %v7169_v20, %v2148_v27 }
 0x270   :  { %v3951_v42 = vmul.f32 0.2, %v3439_v32  ;;  %v4015_v43 = vmul.f32 0.2, %v3503_v33  ;;  %vm3695_vm3 = vcmp.ge.f32.partialorder %v3439_v32, 0.0  ;;  %vm3759_vm4 = vcmp.ge.f32.partialorder %v3503_v33, 0.0 }
 0x271   :  { %vm3568_vm0 = vcmp.ge.f32.partialorder %v3312_v29, 0.0  ;;  %v3824_v31 = vmul.f32 0.2, %v3312_v29  ;;  %vm3632_vm1 = vcmp.ge.f32.partialorder %v3376_v30, 0.0  ;;  %v3888_v35 = vmul.f32 0.2, %v3376_v30 }
 0x272   :  { %v4207_v51 = vsel %vm3695_vm3, %v3439_v32, %v3951_v42  ;;  %v4271_v52 = vsel %vm3759_vm4, %v3503_v33, %v4015_v43 }
 0x273   :  { %v4080_v37 = vsel %vm3568_vm0, %v3312_v29, %v3824_v31  ;;  %v4144_v45 = vsel %vm3632_vm1, %v3376_v30, %v3888_v35 }
 0x274   :  { %v5731_v38 = vpack.c.bf16 %v4080_v37, %v4079_v34  ;;  %v5891_v39 = vpack.c.bf16 %v4144_v45, %v4143_v36 }
 0x275   :  { %v2308_v40 = vpop.f32.mrf.mxu2  ;;  %v2468_v41 = vpop.f32.mrf.mxu3 }
 0x276   :  { %6247 = vst [vmem:[#allocation3 + $0xf0] sm:$0xff] %v5731_v38   ;;  %v3440_v44 = vadd.f32 %v7169_v20, %v2308_v40  ;;  %v3504_v46 = vadd.f32 %v7169_v20, %v2468_v41  ;;  %v1991_v47 = vpop.f32.mrf.mxu0  ;;  %v2151_v48 = vpop.f32.mrf.mxu1 }
 0x277   :  { %6279 = vst [vmem:[#allocation3 + $0x1f0] sm:$0xff] %v5891_v39   ;;  %v3313_v57 = vadd.f32 %v7169_v20, %v1991_v47  ;;  %v3377_v58 = vadd.f32 %v7169_v20, %v2151_v48 }
 0x278   :  { %vm3696_vm5 = vcmp.ge.f32.partialorder %v3440_v44, 0.0  ;;  %v3952_v49 = vmul.f32 0.2, %v3440_v44  ;;  %vm3760_vm6 = vcmp.ge.f32.partialorder %v3504_v46, 0.0  ;;  %v4016_v50 = vmul.f32 0.2, %v3504_v46 }
 0x279   :  { %v3825_v63 = vmul.f32 0.2, %v3313_v57  ;;  %v3889_v0 = vmul.f32 0.2, %v3377_v58  ;;  %vm3569_vm7 = vcmp.ge.f32.partialorder %v3313_v57, 0.0  ;;  %vm3633_vm2 = vcmp.ge.f32.partialorder %v3377_v58, 0.0 }
 0x27a   :  { %v4208_v53 = vsel %vm3696_vm5, %v3440_v44, %v3952_v49  ;;  %v4272_v54 = vsel %vm3760_vm6, %v3504_v46, %v4016_v50 }
 0x27b   :  { %v6051_v55 = vpack.c.bf16 %v4208_v53, %v4207_v51  ;;  %v6211_v56 = vpack.c.bf16 %v4272_v54, %v4271_v52  ;;  %v4081_v7 = vsel %vm3569_vm7, %v3313_v57, %v3825_v63  ;;  %v4145_v8 = vsel %vm3633_vm2, %v3377_v58, %v3889_v0 }
 0x27d   :  { %6311 = vst [vmem:[#allocation3 + $0x2f0] sm:$0xff] %v6051_v55   ;;  %v2311_v59 = vpop.f32.mrf.mxu2  ;;  %v2471_v60 = vpop.f32.mrf.mxu3 }
 0x27e   :  { %6343 = vst [vmem:[#allocation3 + $0x3f0] sm:$0xff] %v6211_v56   ;;  %v1993_v61 = vpop.f32.mrf.mxu0  ;;  %v2153_v62 = vpop.f32.mrf.mxu1  ;;  %v3441_v5 = vadd.f32 %v7169_v20, %v2311_v59  ;;  %v3505_v6 = vadd.f32 %v7169_v20, %v2471_v60 }
 0x27f   :  { %v3314_v1 = vadd.f32 %v7169_v20, %v1993_v61  ;;  %v3378_v2 = vadd.f32 %v7169_v20, %v2153_v62 }
 0x280   :  { %v3953_v15 = vmul.f32 0.2, %v3441_v5  ;;  %v4017_v16 = vmul.f32 0.2, %v3505_v6  ;;  %vm3697_vm10 = vcmp.ge.f32.partialorder %v3441_v5, 0.0  ;;  %vm3761_vm11 = vcmp.ge.f32.partialorder %v3505_v6, 0.0 }
 0x281   :  { %vm3570_vm8 = vcmp.ge.f32.partialorder %v3314_v1, 0.0  ;;  %v3826_v3 = vmul.f32 0.2, %v3314_v1  ;;  %vm3634_vm9 = vcmp.ge.f32.partialorder %v3378_v2, 0.0  ;;  %v3890_v4 = vmul.f32 0.2, %v3378_v2 }
 0x282   :  { %v4209_v23 = vsel %vm3697_vm10, %v3441_v5, %v3953_v15  ;;  %v4273_v24 = vsel %vm3761_vm11, %v3505_v6, %v4017_v16 }
 0x283   :  { %v4082_v9 = vsel %vm3570_vm8, %v3314_v1, %v3826_v3  ;;  %v4146_v10 = vsel %vm3634_vm9, %v3378_v2, %v3890_v4 }
 0x284   :  { %v5736_v11 = vpack.c.bf16 %v4082_v9, %v4081_v7  ;;  %v5896_v12 = vpack.c.bf16 %v4146_v10, %v4145_v8 }
 0x285   :  { %v2313_v13 = vpop.f32.mrf.mxu2  ;;  %v2473_v14 = vpop.f32.mrf.mxu3 }
 0x286   :  { %6248 = vst [vmem:[#allocation3 + $0xf8] sm:$0xff] %v5736_v11   ;;  %v3442_v17 = vadd.f32 %v7169_v20, %v2313_v13  ;;  %v3506_v18 = vadd.f32 %v7169_v20, %v2473_v14 }
 0x287   :  { %6280 = vst [vmem:[#allocation3 + $0x1f8] sm:$0xff] %v5896_v12  }
 0x288   :  { %vm3698_vm12 = vcmp.ge.f32.partialorder %v3442_v17, 0.0  ;;  %v3954_v19 = vmul.f32 0.2, %v3442_v17  ;;  %vm3762_vm13 = vcmp.ge.f32.partialorder %v3506_v18, 0.0  ;;  %v4018_v21 = vmul.f32 0.2, %v3506_v18 }
 0x28a   :  { %v4210_v25 = vsel %vm3698_vm12, %v3442_v17, %v3954_v19  ;;  %v4274_v26 = vsel %vm3762_vm13, %v3506_v18, %v4018_v21 }
 0x28b   :  { %v6056_v27 = vpack.c.bf16 %v4210_v25, %v4209_v23  ;;  %v6216_v28 = vpack.c.bf16 %v4274_v26, %v4273_v24 }
 0x28d   :  { %6312 = vst [vmem:[#allocation3 + $0x2f8] sm:$0xff] %v6056_v27  }
 0x28e   :  { %6344 = vst [vmem:[#allocation3 + $0x3f8] sm:$0xff] %v6216_v28  }
 0x28f   :  { %4799 = dma.vmem_to_hbm [thread:$0]  %s4792_s26, 16384, %s4794_s29, [#allocation4], %s6384_s30, %s6384_s30, %s6385_s4  }
 0x290   :  { %6380 = dma.done.wait [#allocation4], 16384  }
 0x291   :  { %6381 = vsyncadd [#allocation4], 4294950912 }
 0x292   :  { %4804 = vsyncpa [#allocation4], 1 }

</bundles_post_ra>
